<compile_context>
chip_gen: v6e
topology: v6e:2x2x1
jax: 0.10.0
libtpu: 0.0.40
codegen_flags: <defaults>
</compile_context>

<pallas_src>
import functools

import jax
import jax.numpy as jnp
from jax.experimental import pallas as pl
from jax.experimental.pallas import tpu as pltpu


def _round_up(x, m):
    return (x + m - 1) // m * m


def _mha_layer_kernel(qin_ref, kin_ref, vin_ref, res_ref,
                      wq_ref, wk_ref, wv_ref, bq_ref, bk_ref, bv_ref,
                      wo_ref, bo_ref, g_ref, beta_ref,
                      o_ref, kT_scr, v_scr,
                      *, num_heads, ln_eps):
    f32 = jnp.float32
    cdt = kT_scr.dtype            # matmul-operand / cache dtype (input native dtype)

    # --- K/V projections: once per batch, cached in VMEM scratch across row
    #     tiles.  K stored pre-transposed: (H, dh, Nk). ---
    @pl.when(pl.program_id(1) == 0)
    def _():
        kin = kin_ref[0]                                        # (Nk, D)
        vin = vin_ref[0]                                        # (Nk, D)
        for h in range(num_heads):
            k_h = (jnp.dot(kin, wk_ref[h], preferred_element_type=f32)
                   + bk_ref[h].astype(f32))                     # (Nk, dh)
            v_h = (jnp.dot(vin, wv_ref[h], preferred_element_type=f32)
                   + bv_ref[h].astype(f32))                     # (Nk, dh)
            kT_scr[h] = k_h.T.astype(cdt)                       # (dh, Nk)
            v_scr[h] = v_h.astype(cdt)                          # (Nk, dh)

    qin = qin_ref[0]                                            # (tq, D)
    tq, D = qin.shape

    acc = jnp.zeros((tq, D), f32)
    for h in range(num_heads):
        # 1/sqrt(dh) is pre-folded into wq / bq on the host.
        q_h = (jnp.dot(qin, wq_ref[h], preferred_element_type=f32)
               + bq_ref[h].astype(f32))                         # (tq, dh)
        s = jnp.dot(q_h.astype(cdt), kT_scr[h],
                    preferred_element_type=f32)                 # (tq, Nk)
        m = jnp.max(s, axis=-1, keepdims=True)
        p = jnp.exp(s - m)
        l = jnp.sum(p, axis=-1, keepdims=True)
        attn = p * pl.reciprocal(l, approx=True)
        ctx_h = jnp.dot(attn.astype(cdt), v_scr[h],
                        preferred_element_type=f32)             # (tq, dh)
        # Output projection accumulated per head -> no lane-axis head concat.
        acc = acc + jnp.dot(ctx_h.astype(wo_ref.dtype), wo_ref[h],
                            preferred_element_type=f32)         # (tq, D)

    y = acc + bo_ref[...].astype(f32)
    r = res_ref[0].astype(f32) + y                              # residual (orig query)

    # --- Two-pass LayerNorm (centered variance), eps = 1e-5 ---
    d_inv = 1.0 / D
    mean = jnp.sum(r, axis=-1, keepdims=True) * d_inv
    c = r - mean
    var = jnp.sum(c * c, axis=-1, keepdims=True) * d_inv
    out = c * jax.lax.rsqrt(var + ln_eps) * g_ref[...].astype(f32) \
          + beta_ref[...].astype(f32)

    o_ref[0] = out.astype(o_ref.dtype)


@functools.partial(jax.jit, static_argnames=("num_heads", "tm"))
def transformer_layer_forward(query, wq, bq, wk, bk, wv, bv, wo, bo, gamma, beta,
                              key=None, value=None, query_pos=None, key_pos=None,
                              *, num_heads, tm=256):
    """query/key/value: [B, N, D]. Returns LayerNorm(query + MHA(q+qpos, k+kpos, v))."""
    if key is None and value is None:
        key = value = query
        key_pos = query_pos
    q_in = query + query_pos if query_pos is not None else query
    k_in = key + key_pos if key_pos is not None else key
    v_in = value

    B, Nq, D = query.shape
    Nk = k_in.shape[1]
    assert D % num_heads == 0, "embed_dims must be divisible by num_heads"
    dh = D // num_heads
    scale = float(dh) ** -0.5

    # Large row tile (amortizes per-step overhead, big MXU M dim), clamped to
    # the 8-aligned sequence length; pad query rows if needed.
    tq = max(8, min(_round_up(tm, 8), _round_up(Nq, 8)))
    Nq_pad = _round_up(Nq, tq)
    if Nq_pad != Nq:
        pad = ((0, 0), (0, Nq_pad - Nq), (0, 0))
        q_in = jnp.pad(q_in, pad)
        res = jnp.pad(query, pad)
    else:
        res = query

    # Per-head weight layout prepared on the host (leading head axis): avoids
    # lane-axis head slicing and the concatenate in the kernel.  The 1/sqrt(dh)
    # attention scale is folded into the Q projection for free.
    wq_h = (wq * scale).reshape(D, num_heads, dh).transpose(1, 0, 2)   # (H, D, dh)
    wk_h = wk.reshape(D, num_heads, dh).transpose(1, 0, 2)             # (H, D, dh)
    wv_h = wv.reshape(D, num_heads, dh).transpose(1, 0, 2)             # (H, D, dh)
    bq_h = (bq * scale).reshape(num_heads, 1, dh)
    bk_h = bk.reshape(num_heads, 1, dh)
    bv_h = bv.reshape(num_heads, 1, dh)
    wo_h = wo.reshape(num_heads, dh, D)                                # (H, dh, D)
    bo2, g2, beta2 = bo.reshape(1, D), gamma.reshape(1, D), beta.reshape(1, D)

    cdt = query.dtype      # matmul-operand / K-V cache dtype (bf16 in -> bf16 MXU)

    # --- VMEM budget: weights + double-buffered I/O tiles + K/V scratch +
    #     softmax/ctx intermediates, capped at ~75% of this chip's VMEM. ---
    isz = query.dtype.itemsize
    wsz = wq.dtype.itemsize
    weight_bytes = (4 * D * D + 8 * D) * wsz
    io_tile_bytes = (3 * tq * D + 2 * Nk * D) * isz
    kv_scratch_bytes = 2 * Nk * D * isz
    interm_bytes = (2 * tq * Nk + 2 * tq * D) * 4
    est = 2 * (weight_bytes + io_tile_bytes) + kv_scratch_bytes + interm_bytes + (4 << 20)
    try:
        vmem_cap = pltpu.get_tpu_info().vmem_capacity_bytes
    except Exception:
        vmem_cap = 64 << 20
    vmem_limit = int(min(max(est, 16 << 20), vmem_cap * 3 // 4))

    # --- Advisory cost hint for the XLA scheduler ---
    flops = 2 * B * (Nq_pad * D * D          # Q projection
                     + 2 * Nk * D * D        # K/V projections (once per batch)
                     + 2 * Nq_pad * Nk * D   # QK^T + PV
                     + Nq_pad * D * D)       # output projection
    transcendentals = B * num_heads * Nq_pad * Nk
    bytes_accessed = ((3 * B * Nq_pad * D + 2 * B * Nk * D) * isz
                      + (4 * D * D + 8 * D) * wsz)
    cost = pl.CostEstimate(flops=flops, transcendentals=transcendentals,
                           bytes_accessed=bytes_accessed)

    grid = (B, Nq_pad // tq)

    kernel = functools.partial(_mha_layer_kernel, num_heads=num_heads, ln_eps=1e-5)

    out = pl.pallas_call(
        kernel,
        out_shape=jax.ShapeDtypeStruct((B, Nq_pad, D), query.dtype),
        grid_spec=pltpu.PrefetchScalarGridSpec(
            num_scalar_prefetch=0,
            grid=grid,
            in_specs=[
                pl.BlockSpec((1, tq, D), lambda b, i: (b, i, 0)),       # q_in tile
                pl.BlockSpec((1, Nk, D), lambda b, i: (b, 0, 0)),       # k_in (full seq)
                pl.BlockSpec((1, Nk, D), lambda b, i: (b, 0, 0)),       # v    (full seq)
                pl.BlockSpec((1, tq, D), lambda b, i: (b, i, 0)),       # residual tile
                pl.BlockSpec((num_heads, D, dh), lambda b, i: (0, 0, 0)),  # wq (scaled)
                pl.BlockSpec((num_heads, D, dh), lambda b, i: (0, 0, 0)),  # wk
                pl.BlockSpec((num_heads, D, dh), lambda b, i: (0, 0, 0)),  # wv
                pl.BlockSpec((num_heads, 1, dh), lambda b, i: (0, 0, 0)),  # bq (scaled)
                pl.BlockSpec((num_heads, 1, dh), lambda b, i: (0, 0, 0)),  # bk
                pl.BlockSpec((num_heads, 1, dh), lambda b, i: (0, 0, 0)),  # bv
                pl.BlockSpec((num_heads, dh, D), lambda b, i: (0, 0, 0)),  # wo
                pl.BlockSpec((1, D), lambda b, i: (0, 0)),              # bo
                pl.BlockSpec((1, D), lambda b, i: (0, 0)),              # gamma
                pl.BlockSpec((1, D), lambda b, i: (0, 0)),              # beta
            ],
            out_specs=pl.BlockSpec((1, tq, D), lambda b, i: (b, i, 0)),
            scratch_shapes=[
                pltpu.VMEM((num_heads, dh, Nk), cdt),   # cached K^T per head
                pltpu.VMEM((num_heads, Nk, dh), cdt),   # cached V per head
            ],
        ),
        compiler_params=pltpu.CompilerParams(
            dimension_semantics=("parallel", "arbitrary"),
            vmem_limit_bytes=vmem_limit),
        cost_estimate=cost,
    )(q_in, k_in, v_in, res, wq_h, wk_h, wv_h, bq_h, bk_h, bv_h,
      wo_h, bo2, g2, beta2)

    return out[:, :Nq, :]


def reference_layer(query, wq, bq, wk, bk, wv, bv, wo, bo, gamma, beta,
                    key=None, value=None, query_pos=None, key_pos=None, *, num_heads):
    if key is None and value is None:
        key = value = query
        key_pos = query_pos
    if key_pos is not None:
        key = key + key_pos
    q_in = query + query_pos if query_pos is not None else query

    B, Nq, D = query.shape
    dh = D // num_heads
    q = q_in @ wq + bq
    k = key @ wk + bk
    v = value @ wv + bv

    def heads(x):
        return x.reshape(B, -1, num_heads, dh).transpose(0, 2, 1, 3)

    qh, kh, vh = heads(q), heads(k), heads(v)
    s = jnp.einsum("bhqd,bhkd->bhqk", qh, kh) * (dh ** -0.5)
    a = jax.nn.softmax(s, axis=-1)
    ctx = jnp.einsum("bhqk,bhkd->bhqd", a, vh).transpose(0, 2, 1, 3).reshape(B, Nq, D)
    y = ctx @ wo + bo
    r = query + y
    mean = jnp.mean(r, axis=-1, keepdims=True)
    var = jnp.mean((r - mean) ** 2, axis=-1, keepdims=True)
    return (r - mean) * jax.lax.rsqrt(var + 1e-5) * gamma + beta


if __name__ == "__main__":
    # Module config: embed_dims=32, num_heads=4; self-attention with query_pos.
    B, N, D, H = 2, 8, 32, 4

    root = jax.random.PRNGKey(0)
    ks = jax.random.split(root, 12)
    query = jax.random.normal(ks[0], (B, N, D), jnp.float32)
    query_pos = 0.1 * jax.random.normal(ks[1], (B, N, D), jnp.float32)

    # Synthetic MHA / LayerNorm parameters, (D, D) "x @ W" convention.
    wq = 0.08 * jax.random.normal(ks[2], (D, D), jnp.float32)
    wk = 0.08 * jax.random.normal(ks[3], (D, D), jnp.float32)
    wv = 0.08 * jax.random.normal(ks[4], (D, D), jnp.float32)
    wo = 0.08 * jax.random.normal(ks[5], (D, D), jnp.float32)
    bq = 0.01 * jax.random.normal(ks[6], (D,), jnp.float32)
    bk = 0.01 * jax.random.normal(ks[7], (D,), jnp.float32)
    bv = 0.01 * jax.random.normal(ks[8], (D,), jnp.float32)
    bo = 0.01 * jax.random.normal(ks[9], (D,), jnp.float32)
    gamma = 1.0 + 0.05 * jax.random.normal(ks[10], (D,), jnp.float32)
    beta = 0.05 * jax.random.normal(ks[11], (D,), jnp.float32)

    out = transformer_layer_forward(query, wq, bq, wk, bk, wv, bv, wo, bo,
                                    gamma, beta, query_pos=query_pos, num_heads=H)
    jax.block_until_ready(out)

    ref = reference_layer(query, wq, bq, wk, bk, wv, bv, wo, bo, gamma, beta,
                          query_pos=query_pos, num_heads=H)
    assert out.shape == (B, N, D)
    # Tolerance accounts for the approx reciprocal in the softmax normalization.
    err = jnp.max(jnp.abs(out - ref))
    assert jnp.allclose(out, ref, atol=2e-3, rtol=2e-3), f"mismatch vs reference, max err {err}"

    print("KERNEL_OK")
</pallas_src>

<mosaic_0001>
module attributes {stable_mosaic.version = 11 : i64} {
  func.func @_mha_layer_kernel(%arg0: i32, %arg1: i32, %arg2: memref<1x8x32xf32, #tpu.memory_space<vmem>>, %arg3: memref<1x8x32xf32, #tpu.memory_space<vmem>>, %arg4: memref<1x8x32xf32, #tpu.memory_space<vmem>>, %arg5: memref<1x8x32xf32, #tpu.memory_space<vmem>>, %arg6: memref<4x32x8xf32, #tpu.memory_space<vmem>>, %arg7: memref<4x32x8xf32, #tpu.memory_space<vmem>>, %arg8: memref<4x32x8xf32, #tpu.memory_space<vmem>>, %arg9: memref<4x1x8xf32, #tpu.memory_space<vmem>>, %arg10: memref<4x1x8xf32, #tpu.memory_space<vmem>>, %arg11: memref<4x1x8xf32, #tpu.memory_space<vmem>>, %arg12: memref<4x8x32xf32, #tpu.memory_space<vmem>>, %arg13: memref<1x32xf32, #tpu.memory_space<vmem>>, %arg14: memref<1x32xf32, #tpu.memory_space<vmem>>, %arg15: memref<1x32xf32, #tpu.memory_space<vmem>>, %arg16: memref<1x8x32xf32, #tpu.memory_space<vmem>>, %arg17: memref<4x8x8xf32, #tpu.memory_space<vmem>>, %arg18: memref<4x8x8xf32, #tpu.memory_space<vmem>>) attributes {dimension_semantics = [#tpu.dimension_semantics<parallel>, #tpu.dimension_semantics<arbitrary>], iteration_bounds = array<i64: 2, 1>, scalar_prefetch = 0 : i64, scratch_operands = 2 : i64, tpu.core_type = #tpu.core_type<tc>, window_params = [{transform_indices = @transform_0, window_bounds = array<i64: 1, 8, 32>}, {transform_indices = @transform_1, window_bounds = array<i64: 1, 8, 32>}, {transform_indices = @transform_2, window_bounds = array<i64: 1, 8, 32>}, {transform_indices = @transform_3, window_bounds = array<i64: 1, 8, 32>}, {pipeline_mode = #tpu.pipeline_mode<synchronous>, transform_indices = @transform_4, window_bounds = array<i64: 4, 32, 8>}, {pipeline_mode = #tpu.pipeline_mode<synchronous>, transform_indices = @transform_5, window_bounds = array<i64: 4, 32, 8>}, {pipeline_mode = #tpu.pipeline_mode<synchronous>, transform_indices = @transform_6, window_bounds = array<i64: 4, 32, 8>}, {pipeline_mode = #tpu.pipeline_mode<synchronous>, transform_indices = @transform_7, window_bounds = array<i64: 4, 1, 8>}, {pipeline_mode = #tpu.pipeline_mode<synchronous>, transform_indices = @transform_8, window_bounds = array<i64: 4, 1, 8>}, {pipeline_mode = #tpu.pipeline_mode<synchronous>, transform_indices = @transform_9, window_bounds = array<i64: 4, 1, 8>}, {pipeline_mode = #tpu.pipeline_mode<synchronous>, transform_indices = @transform_10, window_bounds = array<i64: 4, 8, 32>}, {pipeline_mode = #tpu.pipeline_mode<synchronous>, transform_indices = @transform_11, window_bounds = array<i64: 1, 32>}, {pipeline_mode = #tpu.pipeline_mode<synchronous>, transform_indices = @transform_12, window_bounds = array<i64: 1, 32>}, {pipeline_mode = #tpu.pipeline_mode<synchronous>, transform_indices = @transform_13, window_bounds = array<i64: 1, 32>}, {transform_indices = @transform_14, window_bounds = array<i64: 1, 8, 32>}]} {
    %c0_i32 = arith.constant 0 : i32
    %0 = arith.cmpi eq, %arg1, %c0_i32 : i32
    %1 = arith.extui %0 : i1 to i32
    %c0_i32_0 = arith.constant 0 : i32
    %2 = arith.cmpi ne, %1, %c0_i32_0 : i32
    scf.if %2 {
      %c0_101 = arith.constant 0 : index
      %c0_102 = arith.constant 0 : index
      %c0_103 = arith.constant 0 : index
      %145 = vector.load %arg3[%c0_101, %c0_102, %c0_103] : memref<1x8x32xf32, #tpu.memory_space<vmem>>, vector<1x8x32xf32>
      %146 = vector.shape_cast %145 : vector<1x8x32xf32> to vector<8x32xf32>
      %c0_104 = arith.constant 0 : index
      %c0_105 = arith.constant 0 : index
      %c0_106 = arith.constant 0 : index
      %147 = vector.load %arg4[%c0_104, %c0_105, %c0_106] : memref<1x8x32xf32, #tpu.memory_space<vmem>>, vector<1x8x32xf32>
      %148 = vector.shape_cast %147 : vector<1x8x32xf32> to vector<8x32xf32>
      %c0_107 = arith.constant 0 : index
      %c0_108 = arith.constant 0 : index
      %c0_109 = arith.constant 0 : index
      %149 = vector.load %arg7[%c0_107, %c0_108, %c0_109] : memref<4x32x8xf32, #tpu.memory_space<vmem>>, vector<1x32x8xf32>
      %150 = vector.shape_cast %149 : vector<1x32x8xf32> to vector<32x8xf32>
      %cst_110 = arith.constant dense<0.000000e+00> : vector<8x8xf32>
      %151 = tpu.matmul %146, %150, %cst_110 {dimension_numbers = #tpu.dot_dimension_numbers<[1], [0], [0], [1], [0, 0, 1, 1], [], []>} : vector<8x32xf32>, vector<32x8xf32>, vector<8x8xf32> -> vector<8x8xf32>
      %c0_111 = arith.constant 0 : index
      %c0_112 = arith.constant 0 : index
      %c0_113 = arith.constant 0 : index
      %152 = vector.load %arg10[%c0_111, %c0_112, %c0_113] : memref<4x1x8xf32, #tpu.memory_space<vmem>>, vector<1x1x8xf32>
      %153 = vector.shape_cast %152 : vector<1x1x8xf32> to vector<1x8xf32>
      %154 = vector.broadcast %153 : vector<1x8xf32> to vector<8x8xf32>
      %155 = arith.addf %151, %154 : vector<8x8xf32>
      %c0_114 = arith.constant 0 : index
      %c0_115 = arith.constant 0 : index
      %c0_116 = arith.constant 0 : index
      %156 = vector.load %arg8[%c0_114, %c0_115, %c0_116] : memref<4x32x8xf32, #tpu.memory_space<vmem>>, vector<1x32x8xf32>
      %157 = vector.shape_cast %156 : vector<1x32x8xf32> to vector<32x8xf32>
      %cst_117 = arith.constant dense<0.000000e+00> : vector<8x8xf32>
      %158 = tpu.matmul %148, %157, %cst_117 {dimension_numbers = #tpu.dot_dimension_numbers<[1], [0], [0], [1], [0, 0, 1, 1], [], []>} : vector<8x32xf32>, vector<32x8xf32>, vector<8x8xf32> -> vector<8x8xf32>
      %c0_118 = arith.constant 0 : index
      %c0_119 = arith.constant 0 : index
      %c0_120 = arith.constant 0 : index
      %159 = vector.load %arg11[%c0_118, %c0_119, %c0_120] : memref<4x1x8xf32, #tpu.memory_space<vmem>>, vector<1x1x8xf32>
      %160 = vector.shape_cast %159 : vector<1x1x8xf32> to vector<1x8xf32>
      %161 = vector.broadcast %160 : vector<1x8xf32> to vector<8x8xf32>
      %162 = arith.addf %158, %161 : vector<8x8xf32>
      %163 = tpu.transpose %155, [1, 0] : vector<8x8xf32> -> vector<8x8xf32>
      %c0_121 = arith.constant 0 : index
      %c0_122 = arith.constant 0 : index
      %c0_123 = arith.constant 0 : index
      %164 = vector.load %arg17[%c0_121, %c0_122, %c0_123] : memref<4x8x8xf32, #tpu.memory_space<vmem>>, vector<1x8x8xf32>
      %165 = vector.shape_cast %164 : vector<1x8x8xf32> to vector<8x8xf32>
      %166 = vector.shape_cast %163 : vector<8x8xf32> to vector<1x8x8xf32>
      tpu.vector_store %arg17[%c0_121, %c0_122, %c0_123], %166 {strides = array<i32>} : memref<4x8x8xf32, #tpu.memory_space<vmem>>, vector<1x8x8xf32>,
      %c0_124 = arith.constant 0 : index
      %c0_125 = arith.constant 0 : index
      %c0_126 = arith.constant 0 : index
      %167 = vector.load %arg18[%c0_124, %c0_125, %c0_126] : memref<4x8x8xf32, #tpu.memory_space<vmem>>, vector<1x8x8xf32>
      %168 = vector.shape_cast %167 : vector<1x8x8xf32> to vector<8x8xf32>
      %169 = vector.shape_cast %162 : vector<8x8xf32> to vector<1x8x8xf32>
      tpu.vector_store %arg18[%c0_124, %c0_125, %c0_126], %169 {strides = array<i32>} : memref<4x8x8xf32, #tpu.memory_space<vmem>>, vector<1x8x8xf32>,
      %c1_127 = arith.constant 1 : index
      %c0_128 = arith.constant 0 : index
      %c0_129 = arith.constant 0 : index
      %170 = vector.load %arg7[%c1_127, %c0_128, %c0_129] : memref<4x32x8xf32, #tpu.memory_space<vmem>>, vector<1x32x8xf32>
      %171 = vector.shape_cast %170 : vector<1x32x8xf32> to vector<32x8xf32>
      %cst_130 = arith.constant dense<0.000000e+00> : vector<8x8xf32>
      %172 = tpu.matmul %146, %171, %cst_130 {dimension_numbers = #tpu.dot_dimension_numbers<[1], [0], [0], [1], [0, 0, 1, 1], [], []>} : vector<8x32xf32>, vector<32x8xf32>, vector<8x8xf32> -> vector<8x8xf32>
      %c1_131 = arith.constant 1 : index
      %c0_132 = arith.constant 0 : index
      %c0_133 = arith.constant 0 : index
      %173 = vector.load %arg10[%c1_131, %c0_132, %c0_133] : memref<4x1x8xf32, #tpu.memory_space<vmem>>, vector<1x1x8xf32>
      %174 = vector.shape_cast %173 : vector<1x1x8xf32> to vector<1x8xf32>
      %175 = vector.broadcast %174 : vector<1x8xf32> to vector<8x8xf32>
      %176 = arith.addf %172, %175 : vector<8x8xf32>
      %c1_134 = arith.constant 1 : index
      %c0_135 = arith.constant 0 : index
      %c0_136 = arith.constant 0 : index
      %177 = vector.load %arg8[%c1_134, %c0_135, %c0_136] : memref<4x32x8xf32, #tpu.memory_space<vmem>>, vector<1x32x8xf32>
      %178 = vector.shape_cast %177 : vector<1x32x8xf32> to vector<32x8xf32>
      %cst_137 = arith.constant dense<0.000000e+00> : vector<8x8xf32>
      %179 = tpu.matmul %148, %178, %cst_137 {dimension_numbers = #tpu.dot_dimension_numbers<[1], [0], [0], [1], [0, 0, 1, 1], [], []>} : vector<8x32xf32>, vector<32x8xf32>, vector<8x8xf32> -> vector<8x8xf32>
      %c1_138 = arith.constant 1 : index
      %c0_139 = arith.constant 0 : index
      %c0_140 = arith.constant 0 : index
      %180 = vector.load %arg11[%c1_138, %c0_139, %c0_140] : memref<4x1x8xf32, #tpu.memory_space<vmem>>, vector<1x1x8xf32>
      %181 = vector.shape_cast %180 : vector<1x1x8xf32> to vector<1x8xf32>
      %182 = vector.broadcast %181 : vector<1x8xf32> to vector<8x8xf32>
      %183 = arith.addf %179, %182 : vector<8x8xf32>
      %184 = tpu.transpose %176, [1, 0] : vector<8x8xf32> -> vector<8x8xf32>
      %c1_141 = arith.constant 1 : index
      %c0_142 = arith.constant 0 : index
      %c0_143 = arith.constant 0 : index
      %185 = vector.load %arg17[%c1_141, %c0_142, %c0_143] : memref<4x8x8xf32, #tpu.memory_space<vmem>>, vector<1x8x8xf32>
      %186 = vector.shape_cast %185 : vector<1x8x8xf32> to vector<8x8xf32>
      %187 = vector.shape_cast %184 : vector<8x8xf32> to vector<1x8x8xf32>
      tpu.vector_store %arg17[%c1_141, %c0_142, %c0_143], %187 {strides = array<i32>} : memref<4x8x8xf32, #tpu.memory_space<vmem>>, vector<1x8x8xf32>,
      %c1_144 = arith.constant 1 : index
      %c0_145 = arith.constant 0 : index
      %c0_146 = arith.constant 0 : index
      %188 = vector.load %arg18[%c1_144, %c0_145, %c0_146] : memref<4x8x8xf32, #tpu.memory_space<vmem>>, vector<1x8x8xf32>
      %189 = vector.shape_cast %188 : vector<1x8x8xf32> to vector<8x8xf32>
      %190 = vector.shape_cast %183 : vector<8x8xf32> to vector<1x8x8xf32>
      tpu.vector_store %arg18[%c1_144, %c0_145, %c0_146], %190 {strides = array<i32>} : memref<4x8x8xf32, #tpu.memory_space<vmem>>, vector<1x8x8xf32>,
      %c2_147 = arith.constant 2 : index
      %c0_148 = arith.constant 0 : index
      %c0_149 = arith.constant 0 : index
      %191 = vector.load %arg7[%c2_147, %c0_148, %c0_149] : memref<4x32x8xf32, #tpu.memory_space<vmem>>, vector<1x32x8xf32>
      %192 = vector.shape_cast %191 : vector<1x32x8xf32> to vector<32x8xf32>
      %cst_150 = arith.constant dense<0.000000e+00> : vector<8x8xf32>
      %193 = tpu.matmul %146, %192, %cst_150 {dimension_numbers = #tpu.dot_dimension_numbers<[1], [0], [0], [1], [0, 0, 1, 1], [], []>} : vector<8x32xf32>, vector<32x8xf32>, vector<8x8xf32> -> vector<8x8xf32>
      %c2_151 = arith.constant 2 : index
      %c0_152 = arith.constant 0 : index
      %c0_153 = arith.constant 0 : index
      %194 = vector.load %arg10[%c2_151, %c0_152, %c0_153] : memref<4x1x8xf32, #tpu.memory_space<vmem>>, vector<1x1x8xf32>
      %195 = vector.shape_cast %194 : vector<1x1x8xf32> to vector<1x8xf32>
      %196 = vector.broadcast %195 : vector<1x8xf32> to vector<8x8xf32>
      %197 = arith.addf %193, %196 : vector<8x8xf32>
      %c2_154 = arith.constant 2 : index
      %c0_155 = arith.constant 0 : index
      %c0_156 = arith.constant 0 : index
      %198 = vector.load %arg8[%c2_154, %c0_155, %c0_156] : memref<4x32x8xf32, #tpu.memory_space<vmem>>, vector<1x32x8xf32>
      %199 = vector.shape_cast %198 : vector<1x32x8xf32> to vector<32x8xf32>
      %cst_157 = arith.constant dense<0.000000e+00> : vector<8x8xf32>
      %200 = tpu.matmul %148, %199, %cst_157 {dimension_numbers = #tpu.dot_dimension_numbers<[1], [0], [0], [1], [0, 0, 1, 1], [], []>} : vector<8x32xf32>, vector<32x8xf32>, vector<8x8xf32> -> vector<8x8xf32>
      %c2_158 = arith.constant 2 : index
      %c0_159 = arith.constant 0 : index
      %c0_160 = arith.constant 0 : index
      %201 = vector.load %arg11[%c2_158, %c0_159, %c0_160] : memref<4x1x8xf32, #tpu.memory_space<vmem>>, vector<1x1x8xf32>
      %202 = vector.shape_cast %201 : vector<1x1x8xf32> to vector<1x8xf32>
      %203 = vector.broadcast %202 : vector<1x8xf32> to vector<8x8xf32>
      %204 = arith.addf %200, %203 : vector<8x8xf32>
      %205 = tpu.transpose %197, [1, 0] : vector<8x8xf32> -> vector<8x8xf32>
      %c2_161 = arith.constant 2 : index
      %c0_162 = arith.constant 0 : index
      %c0_163 = arith.constant 0 : index
      %206 = vector.load %arg17[%c2_161, %c0_162, %c0_163] : memref<4x8x8xf32, #tpu.memory_space<vmem>>, vector<1x8x8xf32>
      %207 = vector.shape_cast %206 : vector<1x8x8xf32> to vector<8x8xf32>
      %208 = vector.shape_cast %205 : vector<8x8xf32> to vector<1x8x8xf32>
      tpu.vector_store %arg17[%c2_161, %c0_162, %c0_163], %208 {strides = array<i32>} : memref<4x8x8xf32, #tpu.memory_space<vmem>>, vector<1x8x8xf32>,
      %c2_164 = arith.constant 2 : index
      %c0_165 = arith.constant 0 : index
      %c0_166 = arith.constant 0 : index
      %209 = vector.load %arg18[%c2_164, %c0_165, %c0_166] : memref<4x8x8xf32, #tpu.memory_space<vmem>>, vector<1x8x8xf32>
      %210 = vector.shape_cast %209 : vector<1x8x8xf32> to vector<8x8xf32>
      %211 = vector.shape_cast %204 : vector<8x8xf32> to vector<1x8x8xf32>
      tpu.vector_store %arg18[%c2_164, %c0_165, %c0_166], %211 {strides = array<i32>} : memref<4x8x8xf32, #tpu.memory_space<vmem>>, vector<1x8x8xf32>,
      %c3_167 = arith.constant 3 : index
      %c0_168 = arith.constant 0 : index
      %c0_169 = arith.constant 0 : index
      %212 = vector.load %arg7[%c3_167, %c0_168, %c0_169] : memref<4x32x8xf32, #tpu.memory_space<vmem>>, vector<1x32x8xf32>
      %213 = vector.shape_cast %212 : vector<1x32x8xf32> to vector<32x8xf32>
      %cst_170 = arith.constant dense<0.000000e+00> : vector<8x8xf32>
      %214 = tpu.matmul %146, %213, %cst_170 {dimension_numbers = #tpu.dot_dimension_numbers<[1], [0], [0], [1], [0, 0, 1, 1], [], []>} : vector<8x32xf32>, vector<32x8xf32>, vector<8x8xf32> -> vector<8x8xf32>
      %c3_171 = arith.constant 3 : index
      %c0_172 = arith.constant 0 : index
      %c0_173 = arith.constant 0 : index
      %215 = vector.load %arg10[%c3_171, %c0_172, %c0_173] : memref<4x1x8xf32, #tpu.memory_space<vmem>>, vector<1x1x8xf32>
      %216 = vector.shape_cast %215 : vector<1x1x8xf32> to vector<1x8xf32>
      %217 = vector.broadcast %216 : vector<1x8xf32> to vector<8x8xf32>
      %218 = arith.addf %214, %217 : vector<8x8xf32>
      %c3_174 = arith.constant 3 : index
      %c0_175 = arith.constant 0 : index
      %c0_176 = arith.constant 0 : index
      %219 = vector.load %arg8[%c3_174, %c0_175, %c0_176] : memref<4x32x8xf32, #tpu.memory_space<vmem>>, vector<1x32x8xf32>
      %220 = vector.shape_cast %219 : vector<1x32x8xf32> to vector<32x8xf32>
      %cst_177 = arith.constant dense<0.000000e+00> : vector<8x8xf32>
      %221 = tpu.matmul %148, %220, %cst_177 {dimension_numbers = #tpu.dot_dimension_numbers<[1], [0], [0], [1], [0, 0, 1, 1], [], []>} : vector<8x32xf32>, vector<32x8xf32>, vector<8x8xf32> -> vector<8x8xf32>
      %c3_178 = arith.constant 3 : index
      %c0_179 = arith.constant 0 : index
      %c0_180 = arith.constant 0 : index
      %222 = vector.load %arg11[%c3_178, %c0_179, %c0_180] : memref<4x1x8xf32, #tpu.memory_space<vmem>>, vector<1x1x8xf32>
      %223 = vector.shape_cast %222 : vector<1x1x8xf32> to vector<1x8xf32>
      %224 = vector.broadcast %223 : vector<1x8xf32> to vector<8x8xf32>
      %225 = arith.addf %221, %224 : vector<8x8xf32>
      %226 = tpu.transpose %218, [1, 0] : vector<8x8xf32> -> vector<8x8xf32>
      %c3_181 = arith.constant 3 : index
      %c0_182 = arith.constant 0 : index
      %c0_183 = arith.constant 0 : index
      %227 = vector.load %arg17[%c3_181, %c0_182, %c0_183] : memref<4x8x8xf32, #tpu.memory_space<vmem>>, vector<1x8x8xf32>
      %228 = vector.shape_cast %227 : vector<1x8x8xf32> to vector<8x8xf32>
      %229 = vector.shape_cast %226 : vector<8x8xf32> to vector<1x8x8xf32>
      tpu.vector_store %arg17[%c3_181, %c0_182, %c0_183], %229 {strides = array<i32>} : memref<4x8x8xf32, #tpu.memory_space<vmem>>, vector<1x8x8xf32>,
      %c3_184 = arith.constant 3 : index
      %c0_185 = arith.constant 0 : index
      %c0_186 = arith.constant 0 : index
      %230 = vector.load %arg18[%c3_184, %c0_185, %c0_186] : memref<4x8x8xf32, #tpu.memory_space<vmem>>, vector<1x8x8xf32>
      %231 = vector.shape_cast %230 : vector<1x8x8xf32> to vector<8x8xf32>
      %232 = vector.shape_cast %225 : vector<8x8xf32> to vector<1x8x8xf32>
      tpu.vector_store %arg18[%c3_184, %c0_185, %c0_186], %232 {strides = array<i32>} : memref<4x8x8xf32, #tpu.memory_space<vmem>>, vector<1x8x8xf32>,
    } else {
    }
    %c0 = arith.constant 0 : index
    %c0_1 = arith.constant 0 : index
    %c0_2 = arith.constant 0 : index
    %3 = vector.load %arg2[%c0, %c0_1, %c0_2] : memref<1x8x32xf32, #tpu.memory_space<vmem>>, vector<1x8x32xf32>
    %4 = vector.shape_cast %3 : vector<1x8x32xf32> to vector<8x32xf32>
    %cst = arith.constant 0.000000e+00 : f32
    %5 = vector.broadcast %cst : f32 to vector<8x32xf32>
    %c0_3 = arith.constant 0 : index
    %c0_4 = arith.constant 0 : index
    %c0_5 = arith.constant 0 : index
    %6 = vector.load %arg6[%c0_3, %c0_4, %c0_5] : memref<4x32x8xf32, #tpu.memory_space<vmem>>, vector<1x32x8xf32>
    %7 = vector.shape_cast %6 : vector<1x32x8xf32> to vector<32x8xf32>
    %cst_6 = arith.constant dense<0.000000e+00> : vector<8x8xf32>
    %8 = tpu.matmul %4, %7, %cst_6 {dimension_numbers = #tpu.dot_dimension_numbers<[1], [0], [0], [1], [0, 0, 1, 1], [], []>} : vector<8x32xf32>, vector<32x8xf32>, vector<8x8xf32> -> vector<8x8xf32>
    %c0_7 = arith.constant 0 : index
    %c0_8 = arith.constant 0 : index
    %c0_9 = arith.constant 0 : index
    %9 = vector.load %arg9[%c0_7, %c0_8, %c0_9] : memref<4x1x8xf32, #tpu.memory_space<vmem>>, vector<1x1x8xf32>
    %10 = vector.shape_cast %9 : vector<1x1x8xf32> to vector<1x8xf32>
    %11 = vector.broadcast %10 : vector<1x8xf32> to vector<8x8xf32>
    %12 = arith.addf %8, %11 : vector<8x8xf32>
    %c0_10 = arith.constant 0 : index
    %c0_11 = arith.constant 0 : index
    %c0_12 = arith.constant 0 : index
    %13 = vector.load %arg17[%c0_10, %c0_11, %c0_12] : memref<4x8x8xf32, #tpu.memory_space<vmem>>, vector<1x8x8xf32>
    %14 = vector.shape_cast %13 : vector<1x8x8xf32> to vector<8x8xf32>
    %cst_13 = arith.constant dense<0.000000e+00> : vector<8x8xf32>
    %15 = tpu.matmul %12, %14, %cst_13 {dimension_numbers = #tpu.dot_dimension_numbers<[1], [0], [0], [1], [0, 0, 1, 1], [], []>} : vector<8x8xf32>, vector<8x8xf32>, vector<8x8xf32> -> vector<8x8xf32>
    %cst_14 = arith.constant dense<0xFF800000> : vector<8xf32>
    %16 = vector.multi_reduction <maximumf>, %15, %cst_14 [1] : vector<8x8xf32> to vector<8xf32>
    %17 = vector.shape_cast %16 : vector<8xf32> to vector<8x1xf32>
    %18 = vector.broadcast %17 : vector<8x1xf32> to vector<8x8xf32>
    %19 = arith.subf %15, %18 : vector<8x8xf32>
    %20 = math.exp %19 : vector<8x8xf32>
    %cst_15 = arith.constant dense<0.000000e+00> : vector<8xf32>
    %21 = vector.multi_reduction <add>, %20, %cst_15 [1] : vector<8x8xf32> to vector<8xf32>
    %22 = vector.shape_cast %21 : vector<8xf32> to vector<8x1xf32>
    %23 = tpu.reciprocal %22 {approx = true} : vector<8x1xf32> -> vector<8x1xf32>
    %24 = vector.broadcast %23 : vector<8x1xf32> to vector<8x8xf32>
    %25 = arith.mulf %20, %24 : vector<8x8xf32>
    %c0_16 = arith.constant 0 : index
    %c0_17 = arith.constant 0 : index
    %c0_18 = arith.constant 0 : index
    %26 = vector.load %arg18[%c0_16, %c0_17, %c0_18] : memref<4x8x8xf32, #tpu.memory_space<vmem>>, vector<1x8x8xf32>
    %27 = vector.shape_cast %26 : vector<1x8x8xf32> to vector<8x8xf32>
    %cst_19 = arith.constant dense<0.000000e+00> : vector<8x8xf32>
    %28 = tpu.matmul %25, %27, %cst_19 {dimension_numbers = #tpu.dot_dimension_numbers<[1], [0], [0], [1], [0, 0, 1, 1], [], []>} : vector<8x8xf32>, vector<8x8xf32>, vector<8x8xf32> -> vector<8x8xf32>
    %c0_20 = arith.constant 0 : index
    %c0_21 = arith.constant 0 : index
    %c0_22 = arith.constant 0 : index
    %29 = vector.load %arg12[%c0_20, %c0_21, %c0_22] : memref<4x8x32xf32, #tpu.memory_space<vmem>>, vector<1x8x32xf32>
    %30 = vector.shape_cast %29 : vector<1x8x32xf32> to vector<8x32xf32>
    %cst_23 = arith.constant dense<0.000000e+00> : vector<8x32xf32>
    %31 = tpu.matmul %28, %30, %cst_23 {dimension_numbers = #tpu.dot_dimension_numbers<[1], [0], [0], [1], [0, 0, 1, 1], [], []>} : vector<8x8xf32>, vector<8x32xf32>, vector<8x32xf32> -> vector<8x32xf32>
    %32 = arith.addf %5, %31 : vector<8x32xf32>
    %c1 = arith.constant 1 : index
    %c0_24 = arith.constant 0 : index
    %c0_25 = arith.constant 0 : index
    %33 = vector.load %arg6[%c1, %c0_24, %c0_25] : memref<4x32x8xf32, #tpu.memory_space<vmem>>, vector<1x32x8xf32>
    %34 = vector.shape_cast %33 : vector<1x32x8xf32> to vector<32x8xf32>
    %cst_26 = arith.constant dense<0.000000e+00> : vector<8x8xf32>
    %35 = tpu.matmul %4, %34, %cst_26 {dimension_numbers = #tpu.dot_dimension_numbers<[1], [0], [0], [1], [0, 0, 1, 1], [], []>} : vector<8x32xf32>, vector<32x8xf32>, vector<8x8xf32> -> vector<8x8xf32>
    %c1_27 = arith.constant 1 : index
    %c0_28 = arith.constant 0 : index
    %c0_29 = arith.constant 0 : index
    %36 = vector.load %arg9[%c1_27, %c0_28, %c0_29] : memref<4x1x8xf32, #tpu.memory_space<vmem>>, vector<1x1x8xf32>
    %37 = vector.shape_cast %36 : vector<1x1x8xf32> to vector<1x8xf32>
    %38 = vector.broadcast %37 : vector<1x8xf32> to vector<8x8xf32>
    %39 = arith.addf %35, %38 : vector<8x8xf32>
    %c1_30 = arith.constant 1 : index
    %c0_31 = arith.constant 0 : index
    %c0_32 = arith.constant 0 : index
    %40 = vector.load %arg17[%c1_30, %c0_31, %c0_32] : memref<4x8x8xf32, #tpu.memory_space<vmem>>, vector<1x8x8xf32>
    %41 = vector.shape_cast %40 : vector<1x8x8xf32> to vector<8x8xf32>
    %cst_33 = arith.constant dense<0.000000e+00> : vector<8x8xf32>
    %42 = tpu.matmul %39, %41, %cst_33 {dimension_numbers = #tpu.dot_dimension_numbers<[1], [0], [0], [1], [0, 0, 1, 1], [], []>} : vector<8x8xf32>, vector<8x8xf32>, vector<8x8xf32> -> vector<8x8xf32>
    %cst_34 = arith.constant dense<0xFF800000> : vector<8xf32>
    %43 = vector.multi_reduction <maximumf>, %42, %cst_34 [1] : vector<8x8xf32> to vector<8xf32>
    %44 = vector.shape_cast %43 : vector<8xf32> to vector<8x1xf32>
    %45 = vector.broadcast %44 : vector<8x1xf32> to vector<8x8xf32>
    %46 = arith.subf %42, %45 : vector<8x8xf32>
    %47 = math.exp %46 : vector<8x8xf32>
    %cst_35 = arith.constant dense<0.000000e+00> : vector<8xf32>
    %48 = vector.multi_reduction <add>, %47, %cst_35 [1] : vector<8x8xf32> to vector<8xf32>
    %49 = vector.shape_cast %48 : vector<8xf32> to vector<8x1xf32>
    %50 = tpu.reciprocal %49 {approx = true} : vector<8x1xf32> -> vector<8x1xf32>
    %51 = vector.broadcast %50 : vector<8x1xf32> to vector<8x8xf32>
    %52 = arith.mulf %47, %51 : vector<8x8xf32>
    %c1_36 = arith.constant 1 : index
    %c0_37 = arith.constant 0 : index
    %c0_38 = arith.constant 0 : index
    %53 = vector.load %arg18[%c1_36, %c0_37, %c0_38] : memref<4x8x8xf32, #tpu.memory_space<vmem>>, vector<1x8x8xf32>
    %54 = vector.shape_cast %53 : vector<1x8x8xf32> to vector<8x8xf32>
    %cst_39 = arith.constant dense<0.000000e+00> : vector<8x8xf32>
    %55 = tpu.matmul %52, %54, %cst_39 {dimension_numbers = #tpu.dot_dimension_numbers<[1], [0], [0], [1], [0, 0, 1, 1], [], []>} : vector<8x8xf32>, vector<8x8xf32>, vector<8x8xf32> -> vector<8x8xf32>
    %c1_40 = arith.constant 1 : index
    %c0_41 = arith.constant 0 : index
    %c0_42 = arith.constant 0 : index
    %56 = vector.load %arg12[%c1_40, %c0_41, %c0_42] : memref<4x8x32xf32, #tpu.memory_space<vmem>>, vector<1x8x32xf32>
    %57 = vector.shape_cast %56 : vector<1x8x32xf32> to vector<8x32xf32>
    %cst_43 = arith.constant dense<0.000000e+00> : vector<8x32xf32>
    %58 = tpu.matmul %55, %57, %cst_43 {dimension_numbers = #tpu.dot_dimension_numbers<[1], [0], [0], [1], [0, 0, 1, 1], [], []>} : vector<8x8xf32>, vector<8x32xf32>, vector<8x32xf32> -> vector<8x32xf32>
    %59 = arith.addf %32, %58 : vector<8x32xf32>
    %c2 = arith.constant 2 : index
    %c0_44 = arith.constant 0 : index
    %c0_45 = arith.constant 0 : index
    %60 = vector.load %arg6[%c2, %c0_44, %c0_45] : memref<4x32x8xf32, #tpu.memory_space<vmem>>, vector<1x32x8xf32>
    %61 = vector.shape_cast %60 : vector<1x32x8xf32> to vector<32x8xf32>
    %cst_46 = arith.constant dense<0.000000e+00> : vector<8x8xf32>
    %62 = tpu.matmul %4, %61, %cst_46 {dimension_numbers = #tpu.dot_dimension_numbers<[1], [0], [0], [1], [0, 0, 1, 1], [], []>} : vector<8x32xf32>, vector<32x8xf32>, vector<8x8xf32> -> vector<8x8xf32>
    %c2_47 = arith.constant 2 : index
    %c0_48 = arith.constant 0 : index
    %c0_49 = arith.constant 0 : index
    %63 = vector.load %arg9[%c2_47, %c0_48, %c0_49] : memref<4x1x8xf32, #tpu.memory_space<vmem>>, vector<1x1x8xf32>
    %64 = vector.shape_cast %63 : vector<1x1x8xf32> to vector<1x8xf32>
    %65 = vector.broadcast %64 : vector<1x8xf32> to vector<8x8xf32>
    %66 = arith.addf %62, %65 : vector<8x8xf32>
    %c2_50 = arith.constant 2 : index
    %c0_51 = arith.constant 0 : index
    %c0_52 = arith.constant 0 : index
    %67 = vector.load %arg17[%c2_50, %c0_51, %c0_52] : memref<4x8x8xf32, #tpu.memory_space<vmem>>, vector<1x8x8xf32>
    %68 = vector.shape_cast %67 : vector<1x8x8xf32> to vector<8x8xf32>
    %cst_53 = arith.constant dense<0.000000e+00> : vector<8x8xf32>
    %69 = tpu.matmul %66, %68, %cst_53 {dimension_numbers = #tpu.dot_dimension_numbers<[1], [0], [0], [1], [0, 0, 1, 1], [], []>} : vector<8x8xf32>, vector<8x8xf32>, vector<8x8xf32> -> vector<8x8xf32>
    %cst_54 = arith.constant dense<0xFF800000> : vector<8xf32>
    %70 = vector.multi_reduction <maximumf>, %69, %cst_54 [1] : vector<8x8xf32> to vector<8xf32>
    %71 = vector.shape_cast %70 : vector<8xf32> to vector<8x1xf32>
    %72 = vector.broadcast %71 : vector<8x1xf32> to vector<8x8xf32>
    %73 = arith.subf %69, %72 : vector<8x8xf32>
    %74 = math.exp %73 : vector<8x8xf32>
    %cst_55 = arith.constant dense<0.000000e+00> : vector<8xf32>
    %75 = vector.multi_reduction <add>, %74, %cst_55 [1] : vector<8x8xf32> to vector<8xf32>
    %76 = vector.shape_cast %75 : vector<8xf32> to vector<8x1xf32>
    %77 = tpu.reciprocal %76 {approx = true} : vector<8x1xf32> -> vector<8x1xf32>
    %78 = vector.broadcast %77 : vector<8x1xf32> to vector<8x8xf32>
    %79 = arith.mulf %74, %78 : vector<8x8xf32>
    %c2_56 = arith.constant 2 : index
    %c0_57 = arith.constant 0 : index
    %c0_58 = arith.constant 0 : index
    %80 = vector.load %arg18[%c2_56, %c0_57, %c0_58] : memref<4x8x8xf32, #tpu.memory_space<vmem>>, vector<1x8x8xf32>
    %81 = vector.shape_cast %80 : vector<1x8x8xf32> to vector<8x8xf32>
    %cst_59 = arith.constant dense<0.000000e+00> : vector<8x8xf32>
    %82 = tpu.matmul %79, %81, %cst_59 {dimension_numbers = #tpu.dot_dimension_numbers<[1], [0], [0], [1], [0, 0, 1, 1], [], []>} : vector<8x8xf32>, vector<8x8xf32>, vector<8x8xf32> -> vector<8x8xf32>
    %c2_60 = arith.constant 2 : index
    %c0_61 = arith.constant 0 : index
    %c0_62 = arith.constant 0 : index
    %83 = vector.load %arg12[%c2_60, %c0_61, %c0_62] : memref<4x8x32xf32, #tpu.memory_space<vmem>>, vector<1x8x32xf32>
    %84 = vector.shape_cast %83 : vector<1x8x32xf32> to vector<8x32xf32>
    %cst_63 = arith.constant dense<0.000000e+00> : vector<8x32xf32>
    %85 = tpu.matmul %82, %84, %cst_63 {dimension_numbers = #tpu.dot_dimension_numbers<[1], [0], [0], [1], [0, 0, 1, 1], [], []>} : vector<8x8xf32>, vector<8x32xf32>, vector<8x32xf32> -> vector<8x32xf32>
    %86 = arith.addf %59, %85 : vector<8x32xf32>
    %c3 = arith.constant 3 : index
    %c0_64 = arith.constant 0 : index
    %c0_65 = arith.constant 0 : index
    %87 = vector.load %arg6[%c3, %c0_64, %c0_65] : memref<4x32x8xf32, #tpu.memory_space<vmem>>, vector<1x32x8xf32>
    %88 = vector.shape_cast %87 : vector<1x32x8xf32> to vector<32x8xf32>
    %cst_66 = arith.constant dense<0.000000e+00> : vector<8x8xf32>
    %89 = tpu.matmul %4, %88, %cst_66 {dimension_numbers = #tpu.dot_dimension_numbers<[1], [0], [0], [1], [0, 0, 1, 1], [], []>} : vector<8x32xf32>, vector<32x8xf32>, vector<8x8xf32> -> vector<8x8xf32>
    %c3_67 = arith.constant 3 : index
    %c0_68 = arith.constant 0 : index
    %c0_69 = arith.constant 0 : index
    %90 = vector.load %arg9[%c3_67, %c0_68, %c0_69] : memref<4x1x8xf32, #tpu.memory_space<vmem>>, vector<1x1x8xf32>
    %91 = vector.shape_cast %90 : vector<1x1x8xf32> to vector<1x8xf32>
    %92 = vector.broadcast %91 : vector<1x8xf32> to vector<8x8xf32>
    %93 = arith.addf %89, %92 : vector<8x8xf32>
    %c3_70 = arith.constant 3 : index
    %c0_71 = arith.constant 0 : index
    %c0_72 = arith.constant 0 : index
    %94 = vector.load %arg17[%c3_70, %c0_71, %c0_72] : memref<4x8x8xf32, #tpu.memory_space<vmem>>, vector<1x8x8xf32>
    %95 = vector.shape_cast %94 : vector<1x8x8xf32> to vector<8x8xf32>
    %cst_73 = arith.constant dense<0.000000e+00> : vector<8x8xf32>
    %96 = tpu.matmul %93, %95, %cst_73 {dimension_numbers = #tpu.dot_dimension_numbers<[1], [0], [0], [1], [0, 0, 1, 1], [], []>} : vector<8x8xf32>, vector<8x8xf32>, vector<8x8xf32> -> vector<8x8xf32>
    %cst_74 = arith.constant dense<0xFF800000> : vector<8xf32>
    %97 = vector.multi_reduction <maximumf>, %96, %cst_74 [1] : vector<8x8xf32> to vector<8xf32>
    %98 = vector.shape_cast %97 : vector<8xf32> to vector<8x1xf32>
    %99 = vector.broadcast %98 : vector<8x1xf32> to vector<8x8xf32>
    %100 = arith.subf %96, %99 : vector<8x8xf32>
    %101 = math.exp %100 : vector<8x8xf32>
    %cst_75 = arith.constant dense<0.000000e+00> : vector<8xf32>
    %102 = vector.multi_reduction <add>, %101, %cst_75 [1] : vector<8x8xf32> to vector<8xf32>
    %103 = vector.shape_cast %102 : vector<8xf32> to vector<8x1xf32>
    %104 = tpu.reciprocal %103 {approx = true} : vector<8x1xf32> -> vector<8x1xf32>
    %105 = vector.broadcast %104 : vector<8x1xf32> to vector<8x8xf32>
    %106 = arith.mulf %101, %105 : vector<8x8xf32>
    %c3_76 = arith.constant 3 : index
    %c0_77 = arith.constant 0 : index
    %c0_78 = arith.constant 0 : index
    %107 = vector.load %arg18[%c3_76, %c0_77, %c0_78] : memref<4x8x8xf32, #tpu.memory_space<vmem>>, vector<1x8x8xf32>
    %108 = vector.shape_cast %107 : vector<1x8x8xf32> to vector<8x8xf32>
    %cst_79 = arith.constant dense<0.000000e+00> : vector<8x8xf32>
    %109 = tpu.matmul %106, %108, %cst_79 {dimension_numbers = #tpu.dot_dimension_numbers<[1], [0], [0], [1], [0, 0, 1, 1], [], []>} : vector<8x8xf32>, vector<8x8xf32>, vector<8x8xf32> -> vector<8x8xf32>
    %c3_80 = arith.constant 3 : index
    %c0_81 = arith.constant 0 : index
    %c0_82 = arith.constant 0 : index
    %110 = vector.load %arg12[%c3_80, %c0_81, %c0_82] : memref<4x8x32xf32, #tpu.memory_space<vmem>>, vector<1x8x32xf32>
    %111 = vector.shape_cast %110 : vector<1x8x32xf32> to vector<8x32xf32>
    %cst_83 = arith.constant dense<0.000000e+00> : vector<8x32xf32>
    %112 = tpu.matmul %109, %111, %cst_83 {dimension_numbers = #tpu.dot_dimension_numbers<[1], [0], [0], [1], [0, 0, 1, 1], [], []>} : vector<8x8xf32>, vector<8x32xf32>, vector<8x32xf32> -> vector<8x32xf32>
    %113 = arith.addf %86, %112 : vector<8x32xf32>
    %c0_84 = arith.constant 0 : index
    %c0_85 = arith.constant 0 : index
    %114 = vector.load %arg13[%c0_84, %c0_85] : memref<1x32xf32, #tpu.memory_space<vmem>>, vector<1x32xf32>
    %115 = vector.broadcast %114 : vector<1x32xf32> to vector<8x32xf32>
    %116 = arith.addf %113, %115 : vector<8x32xf32>
    %c0_86 = arith.constant 0 : index
    %c0_87 = arith.constant 0 : index
    %c0_88 = arith.constant 0 : index
    %117 = vector.load %arg5[%c0_86, %c0_87, %c0_88] : memref<1x8x32xf32, #tpu.memory_space<vmem>>, vector<1x8x32xf32>
    %118 = vector.shape_cast %117 : vector<1x8x32xf32> to vector<8x32xf32>
    %119 = arith.addf %118, %116 : vector<8x32xf32>
    %cst_89 = arith.constant dense<0.000000e+00> : vector<8xf32>
    %120 = vector.multi_reduction <add>, %119, %cst_89 [1] : vector<8x32xf32> to vector<8xf32>
    %121 = vector.shape_cast %120 : vector<8xf32> to vector<8x1xf32>
    %cst_90 = arith.constant 3.125000e-02 : f32
    %122 = vector.broadcast %cst_90 : f32 to vector<8x1xf32>
    %123 = arith.mulf %121, %122 : vector<8x1xf32>
    %124 = vector.broadcast %123 : vector<8x1xf32> to vector<8x32xf32>
    %125 = arith.subf %119, %124 : vector<8x32xf32>
    %126 = arith.mulf %125, %125 : vector<8x32xf32>
    %cst_91 = arith.constant dense<0.000000e+00> : vector<8xf32>
    %127 = vector.multi_reduction <add>, %126, %cst_91 [1] : vector<8x32xf32> to vector<8xf32>
    %128 = vector.shape_cast %127 : vector<8xf32> to vector<8x1xf32>
    %cst_92 = arith.constant 3.125000e-02 : f32
    %129 = vector.broadcast %cst_92 : f32 to vector<8x1xf32>
    %130 = arith.mulf %128, %129 : vector<8x1xf32>
    %cst_93 = arith.constant 9.99999974E-6 : f32
    %131 = vector.broadcast %cst_93 : f32 to vector<8x1xf32>
    %132 = arith.addf %130, %131 : vector<8x1xf32>
    %133 = math.rsqrt %132 : vector<8x1xf32>
    %134 = vector.broadcast %133 : vector<8x1xf32> to vector<8x32xf32>
    %135 = arith.mulf %125, %134 : vector<8x32xf32>
    %c0_94 = arith.constant 0 : index
    %c0_95 = arith.constant 0 : index
    %136 = vector.load %arg14[%c0_94, %c0_95] : memref<1x32xf32, #tpu.memory_space<vmem>>, vector<1x32xf32>
    %137 = vector.broadcast %136 : vector<1x32xf32> to vector<8x32xf32>
    %138 = arith.mulf %135, %137 : vector<8x32xf32>
    %c0_96 = arith.constant 0 : index
    %c0_97 = arith.constant 0 : index
    %139 = vector.load %arg15[%c0_96, %c0_97] : memref<1x32xf32, #tpu.memory_space<vmem>>, vector<1x32xf32>
    %140 = vector.broadcast %139 : vector<1x32xf32> to vector<8x32xf32>
    %141 = arith.addf %138, %140 : vector<8x32xf32>
    %c0_98 = arith.constant 0 : index
    %c0_99 = arith.constant 0 : index
    %c0_100 = arith.constant 0 : index
    %142 = vector.load %arg16[%c0_98, %c0_99, %c0_100] : memref<1x8x32xf32, #tpu.memory_space<vmem>>, vector<1x8x32xf32>
    %143 = vector.shape_cast %142 : vector<1x8x32xf32> to vector<8x32xf32>
    %144 = vector.shape_cast %141 : vector<8x32xf32> to vector<1x8x32xf32>
    tpu.vector_store %arg16[%c0_98, %c0_99, %c0_100], %144 {strides = array<i32>} : memref<1x8x32xf32, #tpu.memory_space<vmem>>, vector<1x8x32xf32>,
    return
  }
  func.func @transform_0(%arg0: i32, %arg1: i32) -> (i32, i32, i32) {
    %c0_i32 = arith.constant 0 : i32
    %c0_i32_0 = arith.constant 0 : i32
    return %arg0, %arg1, %c0_i32 : i32, i32, i32
  }
  func.func @transform_1(%arg0: i32, %arg1: i32) -> (i32, i32, i32) {
    %c0_i32 = arith.constant 0 : i32
    %c0_i32_0 = arith.constant 0 : i32
    %c0_i32_1 = arith.constant 0 : i32
    return %arg0, %c0_i32, %c0_i32_0 : i32, i32, i32
  }
  func.func @transform_2(%arg0: i32, %arg1: i32) -> (i32, i32, i32) {
    %c0_i32 = arith.constant 0 : i32
    %c0_i32_0 = arith.constant 0 : i32
    %c0_i32_1 = arith.constant 0 : i32
    return %arg0, %c0_i32, %c0_i32_0 : i32, i32, i32
  }
  func.func @transform_3(%arg0: i32, %arg1: i32) -> (i32, i32, i32) {
    %c0_i32 = arith.constant 0 : i32
    %c0_i32_0 = arith.constant 0 : i32
    return %arg0, %arg1, %c0_i32 : i32, i32, i32
  }
  func.func @transform_4(%arg0: i32, %arg1: i32) -> (i32, i32, i32) {
    %c0_i32 = arith.constant 0 : i32
    %c0_i32_0 = arith.constant 0 : i32
    %c0_i32_1 = arith.constant 0 : i32
    %c0_i32_2 = arith.constant 0 : i32
    return %c0_i32, %c0_i32_0, %c0_i32_1 : i32, i32, i32
  }
  func.func @transform_5(%arg0: i32, %arg1: i32) -> (i32, i32, i32) {
    %c0_i32 = arith.constant 0 : i32
    %c0_i32_0 = arith.constant 0 : i32
    %c0_i32_1 = arith.constant 0 : i32
    %c0_i32_2 = arith.constant 0 : i32
    return %c0_i32, %c0_i32_0, %c0_i32_1 : i32, i32, i32
  }
  func.func @transform_6(%arg0: i32, %arg1: i32) -> (i32, i32, i32) {
    %c0_i32 = arith.constant 0 : i32
    %c0_i32_0 = arith.constant 0 : i32
    %c0_i32_1 = arith.constant 0 : i32
    %c0_i32_2 = arith.constant 0 : i32
    return %c0_i32, %c0_i32_0, %c0_i32_1 : i32, i32, i32
  }
  func.func @transform_7(%arg0: i32, %arg1: i32) -> (i32, i32, i32) {
    %c0_i32 = arith.constant 0 : i32
    %c0_i32_0 = arith.constant 0 : i32
    %c0_i32_1 = arith.constant 0 : i32
    %c0_i32_2 = arith.constant 0 : i32
    return %c0_i32, %c0_i32_0, %c0_i32_1 : i32, i32, i32
  }
  func.func @transform_8(%arg0: i32, %arg1: i32) -> (i32, i32, i32) {
    %c0_i32 = arith.constant 0 : i32
    %c0_i32_0 = arith.constant 0 : i32
    %c0_i32_1 = arith.constant 0 : i32
    %c0_i32_2 = arith.constant 0 : i32
    return %c0_i32, %c0_i32_0, %c0_i32_1 : i32, i32, i32
  }
  func.func @transform_9(%arg0: i32, %arg1: i32) -> (i32, i32, i32) {
    %c0_i32 = arith.constant 0 : i32
    %c0_i32_0 = arith.constant 0 : i32
    %c0_i32_1 = arith.constant 0 : i32
    %c0_i32_2 = arith.constant 0 : i32
    return %c0_i32, %c0_i32_0, %c0_i32_1 : i32, i32, i32
  }
  func.func @transform_10(%arg0: i32, %arg1: i32) -> (i32, i32, i32) {
    %c0_i32 = arith.constant 0 : i32
    %c0_i32_0 = arith.constant 0 : i32
    %c0_i32_1 = arith.constant 0 : i32
    %c0_i32_2 = arith.constant 0 : i32
    return %c0_i32, %c0_i32_0, %c0_i32_1 : i32, i32, i32
  }
  func.func @transform_11(%arg0: i32, %arg1: i32) -> (i32, i32) {
    %c0_i32 = arith.constant 0 : i32
    %c0_i32_0 = arith.constant 0 : i32
    %c0_i32_1 = arith.constant 0 : i32
    return %c0_i32, %c0_i32_0 : i32, i32
  }
  func.func @transform_12(%arg0: i32, %arg1: i32) -> (i32, i32) {
    %c0_i32 = arith.constant 0 : i32
    %c0_i32_0 = arith.constant 0 : i32
    %c0_i32_1 = arith.constant 0 : i32
    return %c0_i32, %c0_i32_0 : i32, i32
  }
  func.func @transform_13(%arg0: i32, %arg1: i32) -> (i32, i32) {
    %c0_i32 = arith.constant 0 : i32
    %c0_i32_0 = arith.constant 0 : i32
    %c0_i32_1 = arith.constant 0 : i32
    return %c0_i32, %c0_i32_0 : i32, i32
  }
  func.func @transform_14(%arg0: i32, %arg1: i32) -> (i32, i32, i32) {
    %c0_i32 = arith.constant 0 : i32
    %c0_i32_0 = arith.constant 0 : i32
    return %arg0, %arg1, %c0_i32 : i32, i32, i32
  }
}

</mosaic_0001>

<bundles_post_ra>
// kernel: transformer_layer_forward.1
= control target key start
LH: loop header
LB: loop body
LE: loop exit
PB: predicated region body
PF: predicated region fallthrough
CT: control target
= control target key end

     0   :  { %s3905_s0 = inlined_call_operand.vmem [shape: f32[2,8,32], index: 0, kind: input, shape index: {}, may-alias: {0,1}]   ;;  %s3906_s1 = inlined_call_operand.vmem [shape: f32[2,8,32], index: 1, kind: input, shape index: {}, may-alias: {0,1}]   ;;  %s3907_s2 = inlined_call_operand.vmem [shape: f32[2,8,32], index: 2, kind: input, shape index: {}, may-alias: {2,3}]   ;;  %s3908_s3 = inlined_call_operand.vmem [shape: f32[2,8,32], index: 3, kind: input, shape index: {}, may-alias: {2,3}]   ;;  %s3909_s4 = inlined_call_operand.vmem [shape: f32[4,32,8], index: 4, kind: input, shape index: {}]   ;;  %s3910_s5 = inlined_call_operand.vmem [shape: f32[4,32,8], index: 5, kind: input, shape index: {}]   ;;  %s3911_s6 = inlined_call_operand.vmem [shape: f32[4,32,8], index: 6, kind: input, shape index: {}]   ;;  %s3912_s7 = inlined_call_operand.vmem [shape: f32[4,1,8], index: 7, kind: input, shape index: {}]   ;;  %s3913_s8 = inlined_call_operand.vmem [shape: f32[4,1,8], index: 8, kind: input, shape index: {}]   ;;  %s3914_s9 = inlined_call_operand.vmem [shape: f32[4,1,8], index: 9, kind: input, shape index: {}]   ;;  %s3915_s10 = inlined_call_operand.vmem [shape: f32[4,8,32], index: 10, kind: input, shape index: {}]   ;;  %s3916_s11 = inlined_call_operand.vmem [shape: f32[1,32], index: 11, kind: input, shape index: {}]   ;;  %s3917_s12 = inlined_call_operand.vmem [shape: f32[1,32], index: 12, kind: input, shape index: {}]   ;;  %s3918_s13 = inlined_call_operand.vmem [shape: f32[1,32], index: 13, kind: input, shape index: {}]   ;;  %s3919_s14 = inlined_call_operand.hbm [shape: f32[2,8,32], index: 14, kind: output, shape index: {}]  }
   0x1   :  { %3922 = sst [smem:[#allocation10_spill]] %s3905_s0 }
   0x2   :  { %3923 = sst [smem:[#allocation11_spill]] %s3906_s1 }
   0x3   :  { %3924 = sst [smem:[#allocation12_spill]] %s3907_s2 }
   0x4   :  { %3925 = sst [smem:[#allocation13_spill]] %s3908_s3 }
   0x5   :  { %19 = vsyncpa [#allocation5], 0 }
   0x6   :  { %21 = vsyncpa [#allocation5 + $0x1], 0  ;;  %s3418_s29 = smov 0   ;;  %s3420_s30 = smov 0  }
   0x7   :  { %s3422_s15 = smov 0   ;;  %s3424_s16 = smov 0  }
   0x8   :  { %s3426_s17 = smov 0   ;;  %s3428_s18 = smov 0  }
   0x9 LB: > { %3926 = sst [smem:[#allocation7_spill]] %s3334_s17  ;;  %s2810_s19 = sadd.s32 4294967295, %s3338_s18   ;;  %s3338_s18 = sphi %s3428_s18, %s27_s18   ;;  %s3334_s17 = sphi %s3426_s17, %s3937_s17   ;;  %s3330_s16 = sphi %s3424_s16, %s3936_s16   ;;  %s3326_s15 = sphi %s3422_s15, %s3940_s15   ;;  %s3322_s30 = sphi %s3420_s30, %s3939_s30   ;;  %s3318_s29 = sphi %s3418_s29, %s3938_s29  }
   0xa   : > { %s2811_s20 = sadd.s32 4294967294, %s3338_s18   ;;  %s39_s21 = sadd.s32 1, %s3334_s17 }
   0xb   : > { %s366_s22 = sadd.s32 1, %s3326_s15  ;;  %p41_p0 = scmp.ge.s32.totalorder %s39_s21, 2 }
   0xc   : > { %p376_p1 = scmp.ne.s32.totalorder %s3326_s15, %s3322_s30  ;;  %p377_p2 = scmp.eq.s32.totalorder %s2810_s19, 1 }
   0xd   : > { %p382_p3 = scmp.ne.s32.totalorder %s3322_s30, %s3318_s29  ;;  %s3942_s21 = smov (%p41_p0, %s39_s21), 0 }
   0xe   : > { %3927 = sst [smem:[#allocation8_spill]] %s3942_s21  ;;  %p3458_p4 = por %p377_p2, %p376_p1 }
   0xf   : > { %p383_p5 = scmp.eq.s32.totalorder %s2811_s20, 1  ;;  %s361_s24 = ssub.s32 %s3334_s17, %s3942_s21 }
  0x10   : > { %p2814_p6 = scmp.ge.s32.totalorder %s3338_s18, 1  ;;  %p364_p7 = scmp.eq.s32.totalorder %s361_s24, 0 }
  0x11   : > { %p3465_p8 = por %p383_p5, %p382_p3  ;;  %p465_p9 = scmp.lt.s32.totalorder %s3338_s18, 3 }
  0x12   : > { %s3471_s26 = scalar_select %p364_p7, %s3326_s15, %s366_s22  }
  0x13   : > { %p466_p10 = pnand %p2814_p6, %p465_p9 }
  0x14   : > { %3930 = sst [smem:[#allocation9_spill]] %s3471_s26  ;;  %p528_p11 = scmp.lt.s32.totalorder (!%p466_p10), %s3330_s16, 1 }
  0x15   : > { %469 = sbr.rel (%p466_p10) target bundleno = 3727 (0xe8f), region = 76  ;;  %s3931_s1 = sld [smem:[#allocation11_spill]] (!%p466_p10) }
  0x16   : > { %s3932_s0 = sld [smem:[#allocation10_spill]] (!%p466_p10)  ;;  %s2908_s21 = sshll.u32 (!%p466_p10), %s3330_s16, 7 }
  0x17   : > { %s3933_s2 = sld [smem:[#allocation12_spill]] (!%p466_p10) }
  0x18   : > { %s3934_s3 = sld [smem:[#allocation13_spill]] (!%p466_p10) }
  0x1a   : > { %v559_v0 = vld [vmem:[%s3910_s5 + $0x18] sm:$0xff]  ;;  %v3340_v1 = vmov 0.0   ;;  %v558_v2 = vld [vmem:[%s3910_s5 + $0x10] sm:$0xff]  ;;  %vm3341_vm0 = vmmov 0   ;;  %s529_s22 = scalar_select %p528_p11, %s3330_s16, 1  ;;  %v557_v3 = vld [vmem:[%s3910_s5 + $0x8] sm:$0xff] }
  0x1b   : > { %2995 = vmatprep.subr.mxu0 %v3340_v1  ;;  %3003 = vmatprep.mubr.msk.f32.mxu0 %vm3341_vm0, %v3340_v1  ;;  %v556_v4 = vld [vmem:[%s3910_s5] sm:$0xff]  ;;  %vm567_vm1 = vcmask 261120   ;;  %v2827_v6 = vld [vmem:[%s3910_s5 + $0x38] sm:$0xff]  ;;  %v2826_v7 = vld [vmem:[%s3910_s5 + $0x30] sm:$0xff]  ;;  %vm757_vm2 = vcmask 64512  }
  0x1c   : > { %2996 = vmatpush3.msra.mxu0 %v559_v0  ;;  %3006 = vmatprep.subr.mxu1 %v3340_v1  ;;  %s3491_s28 = sshll.u32 %s529_s22, 3  ;;  %v2825_v8 = vld [vmem:[%s3910_s5 + $0x28] sm:$0xff]  ;;  %v2824_v9 = vld [vmem:[%s3910_s5 + $0x20] sm:$0xff]  ;;  %v2841_v10 = vld [vmem:[%s3910_s5 + $0x58] sm:$0xff]  ;;  %s3342_s22 = smov [#allocation4]  }
  0x1d   : > { %2997 = vmatprep.subr.mxu0 %v3340_v1  ;;  %3014 = vmatprep.mubr.msk.f32.mxu1 %vm3341_vm0, %v3340_v1  ;;  %s538_s26 = scalar_lea.vmem %s3931_s1, %s3491_s28  ;;  %v2840_v11 = vld [vmem:[%s3910_s5 + $0x50] sm:$0xff]  ;;  %v2839_v12 = vld [vmem:[%s3910_s5 + $0x48] sm:$0xff]  ;;  %v2838_v13 = vld [vmem:[%s3910_s5 + $0x40] sm:$0xff]  ;;  %s534_s24 = scalar_lea.vmem %s3932_s0, %s3491_s28 }
  0x1e   : > { %2998 = vmatpush3.msra.mxu0 %v558_v2  ;;  %v554_v5 = vld [vmem:[%s538_s26] sm:$0xff]  ;;  %v2855_v14 = vld [vmem:[%s3910_s5 + $0x78] sm:$0xff]  ;;  %v2854_v15 = vld [vmem:[%s3910_s5 + $0x70] sm:$0xff]  ;;  %s542_s0 = scalar_lea.vmem %s3933_s2, %s3491_s28  ;;  %s549_s26 = scalar_lea.vmem %s3934_s3, %s3491_s28 }
  0x1f   : > { %2999 = vmatprep.subr.mxu0 %v3340_v1  ;;  %v2853_v16 = vld [vmem:[%s3910_s5 + $0x68] sm:$0xff]  ;;  %v2852_v17 = vld [vmem:[%s3910_s5 + $0x60] sm:$0xff]  ;;  %v1370_v18 = vld [vmem:[%s3909_s4 + $0x18] sm:$0xff]  ;;  %s525_s28 = sand.u32 1, %s3322_s30   ;;  %s2698_s2 = scalar_lea.hbm %s3919_s14, %s2908_s21 }
  0x20   : > { %3000 = vmatpush3.msra.mxu0 %v557_v3  ;;  %v1369_v19 = vld [vmem:[%s3909_s4 + $0x10] sm:$0xff]  ;;  %v1368_v20 = vld [vmem:[%s3909_s4 + $0x8] sm:$0xff]  ;;  %v1367_v21 = vld [vmem:[%s3909_s4] sm:$0xff]  ;;  %s2686_s3 = scalar_lea.sflag [#allocation5], %s525_s28  ;;  %s3266_s19 = sshll.u32 %s3342_s22, 4  ;;  %s3267_s19 = int_to_ptr.vmem [resolvable:$false] %s3266_s19 }
  0x21   : > { %3001 = vmatprep.subr.mxu0 %v3340_v1  ;;  %v3581_v22 = vld [vmem:[%s534_s24] sm:$0xff]  ;;  %v644_v23 = vld [vmem:[%s3911_s6 + $0x18] sm:$0xff]  ;;  %v643_v24 = vld [vmem:[%s3911_s6 + $0x10] sm:$0xff]  ;;  %s3268_s16 = scalar_lea.vmem %s3267_s19, 256 }
  0x22   : > { %3002 = vmatpush3.msra.mxu0 %v556_v4  ;;  %3007 = vmatpush3.msra.mxu1 %v644_v23  ;;  %v642_v25 = vld [vmem:[%s3911_s6 + $0x8] sm:$0xff]  ;;  %v641_v26 = vld [vmem:[%s3911_s6] sm:$0xff]  ;;  %v2834_v28 = vld [vmem:[%s3911_s6 + $0x38] sm:$0xff] }
  0x23   : > { %3004 = vmatmul.mubr.msk.f32.vlgmr.msra.gmra.mxu0 %vm567_vm1, %v554_v5  ;;  %3017 = vmatprep.subr.mxu0 %v3340_v1  ;;  %v555_v27 = vld [vmem:[%s542_s0] sm:$0xff]  ;;  %v2833_v29 = vld [vmem:[%s3911_s6 + $0x30] sm:$0xff]  ;;  %v2832_v30 = vld [vmem:[%s3911_s6 + $0x28] sm:$0xff]  ;;  %s2815_s0 = sshll.u32 %s525_s28, 3 }
  0x24   : > { %3018 = vmatpush3.msra.mxu0 %v2827_v6  ;;  %3025 = vmatprep.mubr.msk.f32.mxu0 %vm3341_vm0, %v3340_v1  ;;  %v2831_v31 = vld [vmem:[%s3911_s6 + $0x20] sm:$0xff]  ;;  %v2848_v32 = vld [vmem:[%s3911_s6 + $0x58] sm:$0xff]  ;;  %v2847_v33 = vld [vmem:[%s3911_s6 + $0x50] sm:$0xff] }
  0x25   : > { %3019 = vmatprep.subr.mxu0 %v3340_v1  ;;  %3008 = vmatprep.subr.mxu1 %v3340_v1  ;;  %v2846_v34 = vld [vmem:[%s3911_s6 + $0x48] sm:$0xff]  ;;  %v2845_v35 = vld [vmem:[%s3911_s6 + $0x40] sm:$0xff]  ;;  %v2862_v36 = vld [vmem:[%s3911_s6 + $0x78] sm:$0xff] }
  0x26   : > { %3020 = vmatpush3.msra.mxu0 %v2826_v7  ;;  %3009 = vmatpush3.msra.mxu1 %v643_v24  ;;  %v2861_v37 = vld [vmem:[%s3911_s6 + $0x70] sm:$0xff]  ;;  %v2820_v38 = vld [vmem:[%s3913_s8] ss:$0 sm:$0xff]  ;;  %v2860_v39 = vld [vmem:[%s3911_s6 + $0x68] sm:$0xff] }
  0x27   : > { %3021 = vmatprep.subr.mxu0 %v3340_v1  ;;  %3010 = vmatprep.subr.mxu1 %v3340_v1  ;;  %v2859_v41 = vld [vmem:[%s3911_s6 + $0x60] sm:$0xff] }
  0x28   : > { %3022 = vmatpush3.msra.mxu0 %v2825_v8  ;;  %3011 = vmatpush3.msra.mxu1 %v642_v25  ;;  %v2822_v52 = vld [vmem:[%s3914_s9] ss:$0 sm:$0xff]  ;;  %v2836_v56 = vld [vmem:[%s3914_s9 + $0x1] ss:$0 sm:$0xff]  ;;  %v2850_v60 = vld [vmem:[%s3914_s9 + $0x2] ss:$0 sm:$0xff] }
  0x29   : > { %3023 = vmatprep.subr.mxu0 %v3340_v1  ;;  %3012 = vmatprep.subr.mxu1 %v3340_v1  ;;  %v2866_v2 = vld [vmem:[%s3912_s7] ss:$0 sm:$0xff]  ;;  %v2864_v6 = vld [vmem:[%s3914_s9 + $0x3] ss:$0 sm:$0xff]  ;;  %v2829_v23 = vld [vmem:[%s3913_s8 + $0x1] ss:$0 sm:$0xff] }
  0x2a   : > { %3024 = vmatpush3.msra.mxu0 %v2824_v9  ;;  %3013 = vmatpush3.msra.mxu1 %v641_v26  ;;  %v2843_v25 = vld [vmem:[%s3913_s8 + $0x2] ss:$0 sm:$0xff] }
  0x2b   : > { %3039 = vmatprep.subr.mxu0 %v3340_v1  ;;  %3026 = vmatmul.mubr.msk.f32.vlgmr.msra.gmra.mxu0 %vm567_vm1, %v554_v5 }
  0x2c   : > { %3040 = vmatpush3.msra.mxu0 %v2841_v10  ;;  %3047 = vmatprep.mubr.msk.f32.mxu0 %vm3341_vm0, %v3340_v1 }
  0x2d   : > { %3041 = vmatprep.subr.mxu0 %v3340_v1  ;;  %3028 = vmatprep.subr.mxu1 %v3340_v1 }
  0x2e   : > { %3042 = vmatpush3.msra.mxu0 %v2840_v11  ;;  %3015 = vmatmul.mubr.msk.f32.vlgmr.msra.gmra.mxu1 %vm567_vm1, %v555_v27 }
  0x2f   : > { %3043 = vmatprep.subr.mxu0 %v3340_v1  ;;  %3029 = vmatpush3.msra.mxu1 %v2834_v28 }
  0x30   : > { %3044 = vmatpush3.msra.mxu0 %v2839_v12  ;;  %3036 = vmatprep.mubr.msk.f32.mxu1 %vm3341_vm0, %v3340_v1 }
  0x31   : > { %3045 = vmatprep.subr.mxu0 %v3340_v1  ;;  %3030 = vmatprep.subr.mxu1 %v3340_v1 }
  0x32   : > { %3046 = vmatpush3.msra.mxu0 %v2838_v13  ;;  %3031 = vmatpush3.msra.mxu1 %v2833_v29  ;;  %v2873_v13 = vld [vmem:[%s3909_s4 + $0x38] sm:$0xff] }
  0x33   : > { %3061 = vmatprep.subr.mxu0 %v3340_v1  ;;  %3048 = vmatmul.mubr.msk.f32.vlgmr.msra.gmra.mxu0 %vm567_vm1, %v554_v5 }
  0x34   : > { %3062 = vmatpush3.msra.mxu0 %v2855_v14  ;;  %3069 = vmatprep.mubr.msk.f32.mxu0 %vm3341_vm0, %v3340_v1  ;;  %v2872_v14 = vld [vmem:[%s3909_s4 + $0x30] sm:$0xff] }
  0x35   : > { %3063 = vmatprep.subr.mxu0 %v3340_v1  ;;  %3032 = vmatprep.subr.mxu1 %v3340_v1 }
  0x36   : > { %3064 = vmatpush3.msra.mxu0 %v2854_v15  ;;  %3033 = vmatpush3.msra.mxu1 %v2832_v30  ;;  %v2871_v15 = vld [vmem:[%s3909_s4 + $0x28] sm:$0xff] }
  0x37   : > { %3065 = vmatprep.subr.mxu0 %v3340_v1  ;;  %3034 = vmatprep.subr.mxu1 %v3340_v1 }
  0x38   : > { %3066 = vmatpush3.msra.mxu0 %v2853_v16  ;;  %3035 = vmatpush3.msra.mxu1 %v2831_v31  ;;  %v2870_v16 = vld [vmem:[%s3909_s4 + $0x20] sm:$0xff] }
  0x39   : > { %3067 = vmatprep.subr.mxu0 %v3340_v1  ;;  %3050 = vmatprep.subr.mxu1 %v3340_v1 }
  0x3a   : > { %3068 = vmatpush3.msra.mxu0 %v2852_v17  ;;  %3037 = vmatmul.mubr.msk.f32.vlgmr.msra.gmra.mxu1 %vm567_vm1, %v555_v27 }
  0x3b   : > { %3083 = vmatprep.subr.mxu0 %v3340_v1  ;;  %3070 = vmatmul.mubr.msk.f32.vlgmr.msra.gmra.mxu0 %vm567_vm1, %v554_v5 }
  0x3c   : > { %3084 = vmatpush3.msra.mxu0 %v1370_v18  ;;  %3091 = vmatprep.mubr.msk.f32.mxu0 %vm3341_vm0, %v3340_v1 }
  0x3d   : > { %3085 = vmatprep.subr.mxu0 %v3340_v1  ;;  %3051 = vmatpush3.msra.mxu1 %v2848_v32 }
  0x3e   : > { %3086 = vmatpush3.msra.mxu0 %v1369_v19  ;;  %3058 = vmatprep.mubr.msk.f32.mxu1 %vm3341_vm0, %v3340_v1 }
  0x3f   : > { %3087 = vmatprep.subr.mxu0 %v3340_v1  ;;  %3052 = vmatprep.subr.mxu1 %v3340_v1 }
  0x40   : > { %3088 = vmatpush3.msra.mxu0 %v1368_v20  ;;  %3053 = vmatpush3.msra.mxu1 %v2847_v33  ;;  %v2875_v33 = vld [vmem:[%s3912_s7 + $0x1] ss:$0 sm:$0xff] }
  0x41   : > { %3089 = vmatprep.subr.mxu0 %v3340_v1  ;;  %3054 = vmatprep.subr.mxu1 %v3340_v1 }
  0x42   : > { %3090 = vmatpush3.msra.mxu0 %v1367_v21  ;;  %3055 = vmatpush3.msra.mxu1 %v2846_v34 }
  0x43   : > { %3092 = vmatmul.mubr.msk.f32.vlgmr.msra.gmra.mxu0 %vm567_vm1, %v3581_v22  ;;  %3104 = vmatprep.subr.mxu0 %v3340_v1 }
  0x44   : > { %3112 = vmatprep.mubr.msk.f32.mxu0 %vm3341_vm0, %v3340_v1  ;;  %3056 = vmatprep.subr.mxu1 %v3340_v1 }
  0x45   : > { %3057 = vmatpush3.msra.mxu1 %v2845_v35  ;;  %3105 = vmatpush3.msra.mxu0 %v2873_v13 }
  0x46   : > { %3072 = vmatprep.subr.mxu1 %v3340_v1  ;;  %3059 = vmatmul.mubr.msk.f32.vlgmr.msra.gmra.mxu1 %vm567_vm1, %v555_v27 }
  0x47   : > { %3073 = vmatpush3.msra.mxu1 %v2862_v36  ;;  %3080 = vmatprep.mubr.msk.f32.mxu1 %vm3341_vm0, %v3340_v1 }
  0x48   : > { %3074 = vmatprep.subr.mxu1 %v3340_v1  ;;  %3106 = vmatprep.subr.mxu0 %v3340_v1 }
  0x49   : > { %3075 = vmatpush3.msra.mxu1 %v2861_v37  ;;  %3107 = vmatpush3.msra.mxu0 %v2872_v14 }
  0x4a   : > { %3076 = vmatprep.subr.mxu1 %v3340_v1  ;;  %3108 = vmatprep.subr.mxu0 %v3340_v1 }
  0x4b   : > { %3077 = vmatpush3.msra.mxu1 %v2860_v39  ;;  %3109 = vmatpush3.msra.mxu0 %v2871_v15 }
  0x4c   : > { %3078 = vmatprep.subr.mxu1 %v3340_v1  ;;  %3110 = vmatprep.subr.mxu0 %v3340_v1 }
  0x4d   : > { %3079 = vmatpush3.msra.mxu1 %v2859_v41  ;;  %3111 = vmatpush3.msra.mxu0 %v2870_v16 }
  0x4e   : > { %3081 = vmatmul.mubr.msk.f32.vlgmr.msra.gmra.mxu1 %vm567_vm1, %v555_v27  ;;  %3094 = vmatprep.subr.mxu1 %v3340_v1 }
  0x4f   : > { %3096 = vmatprep.mubr.msk.f32.mxu1 %vm3341_vm0, %v3340_v1  ;;  %3113 = vmatmul.mubr.msk.f32.vlgmr.msra.gmra.mxu0 %vm567_vm1, %v3581_v22 }
  0x50   : > { %3125 = vmatprep.subr.mxu0 %v3340_v1  ;;  %3127 = vmatprep.mubr.msk.f32.mxu0 %vm3341_vm0, %v3340_v1 }
  0xe3   : > { %v637_v40 = vpop.f32.mrf.mxu0 }
  0xe4   : > { %v638_v42 = vadd.f32 %v2820_v38, %v637_v40 }
  0xe5   : > { %v3005_v43 = vpop.f32.mrf.mxu0 }
  0xe6   : > { %725 = vxpose.xlu0.b32.start.end [1/1] (short) (narrow) %v638_v42, 8 }
  0xeb   : > { %v3672_v44 = vpop.f32.mrf.mxu0 }
  0xec   : > { %v840_v24 = vadd.f32 %v2829_v23, %v3672_v44  ;;  %v2894_v23 = vld [vmem:[%s3909_s4 + $0x68] sm:$0xff] }
  0xed   : > { %v3027_v45 = vpop.f32.mrf.mxu0 }
  0xee   : > { %v721_v53 = vpop.f32.mrf.mxu1 }
  0xef   : > { %v722_v54 = vadd.f32 %v2822_v52, %v721_v53  ;;  %v1612_v52 = vld [vmem:[%s3915_s10] sm:$0xff] }
  0xf0   : > { %v3016_v55 = vpop.f32.mrf.mxu1 }
  0xf1   : > { %759 = vst.msk [vmem:[#allocation3] sm:$0xff] %vm757_vm2, %v722_v54  ;;  %v2885_v54 = vld [vmem:[%s3909_s4 + $0x58] sm:$0xff] }
  0xf3   : > { %v3674_v46 = vpop.f32.mrf.mxu0 }
  0xf4   : > { %v1042_v27 = vadd.f32 %v2843_v25, %v3674_v46  ;;  %v2891_v25 = vld [vmem:[%s3915_s10 + $0x10] sm:$0xff] }
  0xf5   : > { %v3049_v47 = vpop.f32.mrf.mxu0 }
  0xf6   : > { %v2879_v47 = vld [vmem:[%s3915_s10 + $0x8] sm:$0xff] }
  0xf7   : > { %3126 = vmatpush3.msra.mxu0 %v2879_v47  ;;  %v2902_v47 = vld [vmem:[%s3915_s10 + $0x18] sm:$0xff] }
  0xf8   : > { %v1538_v5 = vld [vmem:[#allocation3] sm:$0xff]  ;;  %3135 = vmatprep.subr.mxu0 %v3340_v1 }
  0xfa   : > { %v922_v57 = vpop.f32.mrf.mxu1 }
  0xfb   : > { %v3676_v48 = vpop.f32.mrf.mxu0  ;;  %v923_v58 = vadd.f32 %v2836_v56, %v922_v57  ;;  %v2884_v56 = vld [vmem:[%s3909_s4 + $0x50] sm:$0xff] }
  0xfc   : > { %v3038_v59 = vpop.f32.mrf.mxu1 }
  0xfd   : > { %v3071_v49 = vpop.f32.mrf.mxu0  ;;  %961 = vst.msk [vmem:[#allocation3 + $0x8] sm:$0xff] %vm757_vm2, %v923_v58  ;;  %v2883_v58 = vld [vmem:[%s3909_s4 + $0x48] sm:$0xff] }
 0x103   : > { %v1448_v50 = vpop.f32.mrf.mxu0 }
 0x104   : > { %v1449_v3 = vadd.f32 %v2866_v2, %v1448_v50  ;;  %v1783_v36 = vld [vmem:[#allocation3 + $0x8] sm:$0xff]  ;;  %v2887_v2 = vld [vmem:[%s3912_s7 + $0x2] ss:$0 sm:$0xff] }
 0x105   : > { %v3093_v51 = vpop.f32.mrf.mxu0 }
 0x106   : > { %v1124_v61 = vpop.f32.mrf.mxu1 }
 0x107   : > { %v1125_v62 = vadd.f32 %v2850_v60, %v1124_v61  ;;  %v2882_v60 = vld [vmem:[%s3909_s4 + $0x40] sm:$0xff] }
 0x108   : > { %v3060_v63 = vpop.f32.mrf.mxu1 }
 0x109   : > { %1163 = vst.msk [vmem:[#allocation3 + $0x10] sm:$0xff] %vm757_vm2, %v1125_v62 }
 0x10e   : > { %v1326_v7 = vpop.f32.mrf.mxu1 }
 0x10f   : > { %v1327_v8 = vadd.f32 %v2864_v6, %v1326_v7  ;;  %v1692_v26 = vpop.f32.mrf.mxu0 }
 0x110   : > { %v3082_v9 = vpop.f32.mrf.mxu1  ;;  %v1693_v34 = vadd.f32 %v2875_v33, %v1692_v26  ;;  %v2175_v6 = vld [vmem:[#allocation3 + $0x10] sm:$0xff] }
 0x111   : > { %1365 = vst.msk [vmem:[#allocation3 + $0x18] sm:$0xff] %vm757_vm2, %v1327_v8  ;;  %v3114_v28 = vpop.f32.mrf.mxu0 }
 0x162   : > { %v741_v0 = vpop.trf.xlu0 }
 0x163   : > { %758 = vst.msk [vmem:[#allocation2] sm:$0xff] %vm757_vm2, %v741_v0 }
 0x16a   : > { %v1452_v4 = vld [vmem:[#allocation2] sm:$0xff] }
 0x16b   : > { %3095 = vmatpush3.msra.mxu1 %v1452_v4 }
 0x16c   : > { %3097 = vmatmul.mubr.msk.f32.vlgmr.msra.gmra.mxu1 %vm757_vm2, %v1449_v3  ;;  %3099 = vmatprep.subr.mxu1 %v3340_v1 }
 0x16d   : > { %3100 = vmatpush3.msra.mxu1 %v1538_v5  ;;  %3101 = vmatprep.mubr.msk.f32.mxu1 %vm3341_vm0, %v3340_v1 }
 0x16e   : > { %3115 = vmatprep.subr.mxu1 %v3340_v1 }
 0x22c   : > { %v1523_v10 = vpop.f32.mrf.mxu1 }
 0x22d   : > { %v1527_v11 = vsel %vm757_vm2, %v1523_v10, -inf }
 0x22e   : > { %1528 = vmax.xlane.f32.xlu0 %v1527_v11  ;;  %v3098_v12 = vpop.f32.mrf.mxu1 }
 0x2b7   : > { %v1529_v17 = vpop.xlane.xlu0 %1528 }
 0x2b8   : > { %v1530_v18 = vsub.f32 %v1523_v10, %v1529_v17  ;;  %v2857_v10 = vld [vmem:[%s3913_s8 + $0x3] ss:$0 sm:$0xff] }
 0x2b9   : > { %v1244_v11 = vadd.f32 %v2857_v10, %v3676_v48  ;;  %v2896_v48 = vld [vmem:[%s3909_s4 + $0x78] sm:$0xff] }
 0x2ba   : > { %v1531_v19 = vmul.f32 1.442695, %v1530_v18 }
 0x2bc   : > { %3244 = vpow2.f32 %v1531_v19 }
 0x2c9   : > { %v3245_v20 = vpop.eup %3244 }
 0x2ca   : > { %v1533_v21 = vsel %vm757_vm2, %v3245_v20, 0.0 }
 0x2cb   : > { %1534 = vadd.xlane.f32.xlu1 %v1533_v21  ;;  %v2895_v21 = vld [vmem:[%s3909_s4 + $0x70] sm:$0xff] }
 0x2fe   : > { %926 = vxpose.xlu1.b32.start.end [1/1] (short) (narrow) %v840_v24, 8  ;;  %v2893_v24 = vld [vmem:[%s3909_s4 + $0x60] sm:$0xff] }
 0x302   : > { %1128 = vxpose.xlu1.b32.start.end [1/1] (short) (narrow) %v1042_v27, 8 }
 0x354   : > { %v1535_v29 = vpop.xlane.xlu1 %1534 }
 0x355   : > { %3246 = vrcp.f32 %v1535_v29 }
 0x362   : > { %v3247_v30 = vpop.eup %3246 }
 0x363   : > { %v1537_v31 = vmul.f32 %v3247_v30, %v3245_v20 }
 0x365   : > { %3102 = vmatmul.mubr.msk.f32.vlgmr.msra.gmra.mxu1 %vm757_vm2, %v1537_v31 }
 0x366   : > { %3117 = vmatprep.mubr.msk.f32.mxu1 %vm3341_vm0, %v3340_v1 }
 0x37a   : > { %v942_v32 = vpop.trf.xlu1 }
 0x37b   : > { %959 = vst.msk [vmem:[#allocation2 + $0x8] sm:$0xff] %vm757_vm2, %v942_v32  ;;  %v2495_v32 = vld [vmem:[#allocation3 + $0x18] sm:$0xff] }
 0x37e   : > { %v1144_v53 = vpop.trf.xlu1 }
 0x37f   : > { %1161 = vst.msk [vmem:[#allocation2 + $0x10] sm:$0xff] %vm757_vm2, %v1144_v53 }
 0x382   : > { %v1697_v35 = vld [vmem:[#allocation2 + $0x8] sm:$0xff] }
 0x383   : > { %3116 = vmatpush3.msra.mxu1 %v1697_v35 }
 0x384   : > { %3118 = vmatmul.mubr.msk.f32.vlgmr.msra.gmra.mxu1 %vm757_vm2, %v1693_v34  ;;  %3120 = vmatprep.subr.mxu1 %v3340_v1 }
 0x385   : > { %3121 = vmatpush3.msra.mxu1 %v1783_v36  ;;  %3122 = vmatprep.mubr.msk.f32.mxu1 %vm3341_vm0, %v3340_v1 }
 0x386   : > { %3130 = vmatprep.subr.mxu1 %v3340_v1  ;;  %v2089_v62 = vld [vmem:[#allocation2 + $0x10] sm:$0xff] }
 0x425   : > { %v1608_v37 = vpop.f32.mrf.mxu1 }
 0x427   : > { %v3103_v38 = vpop.f32.mrf.mxu1 }
 0x444   : > { %v1767_v39 = vpop.f32.mrf.mxu1 }
 0x445   : > { %v1771_v40 = vsel %vm757_vm2, %v1767_v39, -inf }
 0x446   : > { %1772 = vmax.xlane.f32.xlu0 %v1771_v40  ;;  %v3119_v41 = vpop.f32.mrf.mxu1 }
 0x4cf   : > { %v1773_v42 = vpop.xlane.xlu0 %1772 }
 0x4d0   : > { %v1774_v43 = vsub.f32 %v1767_v39, %v1773_v42 }
 0x4d2   : > { %v1775_v44 = vmul.f32 1.442695, %v1774_v43 }
 0x4d4   : > { %3248 = vpow2.f32 %v1775_v44 }
 0x4e1   : > { %v3249_v45 = vpop.eup %3248 }
 0x4e2   : > { %v1777_v46 = vsel %vm757_vm2, %v3249_v45, 0.0 }
 0x4e3   : > { %1778 = vadd.xlane.f32.xlu0 %v1777_v46 }
 0x56c   : > { %v1779_v49 = vpop.xlane.xlu0 %1778 }
 0x56d   : > { %3250 = vrcp.f32 %v1779_v49 }
 0x57a   : > { %v3251_v50 = vpop.eup %3250 }
 0x57b   : > { %v1781_v51 = vmul.f32 %v3251_v50, %v3249_v45 }
 0x57d   : > { %3123 = vmatmul.mubr.msk.f32.vlgmr.msra.gmra.mxu1 %vm757_vm2, %v1781_v51 }
 0x57e   : > { %3131 = vmatpush3.msra.mxu1 %v1612_v52  ;;  %3132 = vmatprep.mubr.msk.f32.mxu1 %vm3341_vm0, %v3340_v1  ;;  %v2904_v52 = vld [vmem:[%s3916_s11] ss:$0 sm:$0xff] }
 0x57f   : > { %3146 = vmatprep.subr.mxu1 %v3340_v1 }
 0x581   : > { %3133 = vmatmul.mubr.msk.f32.vlgmr.msra.gmra.mxu1 %vm757_vm2, %v1608_v37 }
 0x582   : > { %3148 = vmatprep.mubr.msk.f32.mxu1 %vm3341_vm0, %v3340_v1  ;;  %3147 = vmatpush3.msra.mxu1 %v2089_v62 }
 0x583   : > { %3151 = vmatprep.subr.mxu1 %v3340_v1 }
 0x63d   : > { %v1853_v55 = vpop.f32.mrf.mxu1 }
 0x63e   : > { %3128 = vmatmul.mubr.msk.f32.vlgmr.msra.gmra.mxu0 %vm757_vm2, %v1853_v55  ;;  %v2653_v55 = vld [vmem:[%s549_s26] sm:$0xff]  ;;  %s527_s26 = scalar_lea.vmem [#allocation4], %s2815_s0 }
 0x63f   : > { %3136 = vmatpush3.msra.mxu0 %v2885_v54  ;;  %v3124_v57 = vpop.f32.mrf.mxu1  ;;  %3143 = vmatprep.mubr.msk.f32.mxu0 %vm3341_vm0, %v3340_v1  ;;  %s2700_s20 = sshll.u32 %s527_s26, 4  ;;  %s2701_s20 = int_to_ptr.vmem [resolvable:$true] %s2700_s20 }
 0x640   : > { %3137 = vmatprep.subr.mxu0 %v3340_v1  ;;  %s3262_s27 = scalar_lea.vmem %s2701_s20, 128  ;;  %p3269_p1 = scmp.lt.s32.totalorder %s2701_s20, %s3267_s19 }
 0x641   : > { %3138 = vmatpush3.msra.mxu0 %v2884_v56  ;;  %v3775_v59 = vpop.f32.mrf.mxu1  ;;  %p3263_p12 = scmp.ne.s32.totalorder %s2701_s20, %s3262_s27  ;;  %p3270_p2 = scmp.lt.s32.totalorder %s3268_s16, %s3262_s27 }
 0x642   : > { %3139 = vmatprep.subr.mxu0 %v3340_v1 }
 0x643   : > { %3140 = vmatpush3.msra.mxu0 %v2883_v58  ;;  %v3134_v61 = vpop.f32.mrf.mxu1  ;;  %p3264_p13 = pnand %p3263_p12, %p3458_p4  ;;  %p3271_p3 = por %p3270_p2, %p3269_p1 }
 0x644   : > { %3141 = vmatprep.subr.mxu0 %v3340_v1 }
 0x645   : > { %3142 = vmatpush3.msra.mxu0 %v2882_v60  ;;  %p3265_p0 = pneg %p3264_p13 }
 0x646   : > { %3144 = vmatmul.mubr.msk.f32.vlgmr.msra.gmra.mxu0 %vm567_vm1, %v3581_v22  ;;  %3156 = vmatprep.subr.mxu0 %v3340_v1 }
 0x647   : > { %3158 = vmatprep.mubr.msk.f32.mxu0 %vm3341_vm0, %v3340_v1  ;;  %3157 = vmatpush3.msra.mxu0 %v2891_v25  ;;  %p3272_p5 = pnand %p3271_p3, %p3265_p0 }
 0x648   : > { %3172 = vmatprep.subr.mxu0 %v3340_v1 }
 0x6fe   : > { %v3788_v63 = vpop.f32.mrf.mxu0 }
 0x6ff   : > { %v2002_v33 = vadd.f32 %v3775_v59, %v3788_v63 }
 0x700   : > { %v3129_v0 = vpop.f32.mrf.mxu0 }
 0x706   : > { %v2084_v3 = vpop.f32.mrf.mxu0 }
 0x707   : > { %v2085_v4 = vadd.f32 %v2887_v2, %v2084_v3 }
 0x708   : > { %v3145_v5 = vpop.f32.mrf.mxu0 }
 0x709   : > { %3149 = vmatmul.mubr.msk.f32.vlgmr.msra.gmra.mxu1 %vm757_vm2, %v2085_v4  ;;  %v2905_v5 = vld [vmem:[%s3917_s12] ss:$0 sm:$0xff] }
 0x70a   : > { %3152 = vmatpush3.msra.mxu1 %v2175_v6  ;;  %3153 = vmatprep.mubr.msk.f32.mxu1 %vm3341_vm0, %v3340_v1 }
 0x70b   : > { %3161 = vmatprep.subr.mxu1 %v3340_v1 }
 0x7c9   : > { %v2159_v7 = vpop.f32.mrf.mxu1 }
 0x7ca   : > { %v2163_v8 = vsel %vm757_vm2, %v2159_v7, -inf }
 0x7cb   : > { %2164 = vmax.xlane.f32.xlu0 %v2163_v8  ;;  %v3150_v9 = vpop.f32.mrf.mxu1 }
 0x7f8   : > { %1330 = vxpose.xlu0.b32.start.end [1/1] (short) (narrow) %v1244_v11, 8 }
 0x854   : > { %v2165_v12 = vpop.xlane.xlu0 %2164 }
 0x855   : > { %v2166_v13 = vsub.f32 %v2159_v7, %v2165_v12  ;;  %v2906_v7 = vld [vmem:[%s3918_s13] ss:$0 sm:$0xff] }
 0x857   : > { %v2167_v14 = vmul.f32 1.442695, %v2166_v13 }
 0x859   : > { %3252 = vpow2.f32 %v2167_v14 }
 0x866   : > { %v3253_v15 = vpop.eup %3252 }
 0x867   : > { %v2169_v16 = vsel %vm757_vm2, %v3253_v15, 0.0 }
 0x868   : > { %2170 = vadd.xlane.f32.xlu1 %v2169_v16 }
 0x874   : > { %v1346_v17 = vpop.trf.xlu0 }
 0x875   : > { %1363 = vst.msk [vmem:[#allocation2 + $0x18] sm:$0xff] %vm757_vm2, %v1346_v17 }
 0x87c   : > { %v2409_v26 = vld [vmem:[#allocation2 + $0x18] sm:$0xff] }
 0x8f1   : > { %v2171_v18 = vpop.xlane.xlu1 %2170 }
 0x8f2   : > { %3254 = vrcp.f32 %v2171_v18 }
 0x8ff   : > { %v3255_v19 = vpop.eup %3254 }
 0x900   : > { %v2173_v20 = vmul.f32 %v3255_v19, %v3253_v15 }
 0x902   : > { %3154 = vmatmul.mubr.msk.f32.vlgmr.msra.gmra.mxu1 %vm757_vm2, %v2173_v20 }
 0x903   : > { %3162 = vmatpush3.msra.mxu1 %v2896_v48  ;;  %3169 = vmatprep.mubr.msk.f32.mxu1 %vm3341_vm0, %v3340_v1 }
 0x904   : > { %3163 = vmatprep.subr.mxu1 %v3340_v1 }
 0x905   : > { %3164 = vmatpush3.msra.mxu1 %v2895_v21 }
 0x906   : > { %3165 = vmatprep.subr.mxu1 %v3340_v1 }
 0x907   : > { %3166 = vmatpush3.msra.mxu1 %v2894_v23 }
 0x908   : > { %3167 = vmatprep.subr.mxu1 %v3340_v1 }
 0x909   : > { %3168 = vmatpush3.msra.mxu1 %v2893_v24 }
 0x90a   : > { %3170 = vmatmul.mubr.msk.f32.vlgmr.msra.gmra.mxu1 %vm567_vm1, %v3581_v22  ;;  %3182 = vmatprep.subr.mxu1 %v3340_v1  ;;  %v2898_v22 = vld [vmem:[%s3912_s7 + $0x3] ss:$0 sm:$0xff] }
 0x90b   : > { %3184 = vmatprep.mubr.msk.f32.mxu1 %vm3341_vm0, %v3340_v1  ;;  %3183 = vmatpush3.msra.mxu1 %v2902_v47 }
 0x9c2   : > { %v2245_v27 = vpop.f32.mrf.mxu1 }
 0x9c3   : > { %3159 = vmatmul.mubr.msk.f32.vlgmr.msra.gmra.mxu0 %vm757_vm2, %v2245_v27 }
 0x9c4   : > { %v3155_v28 = vpop.f32.mrf.mxu1  ;;  %3173 = vmatpush3.msra.mxu0 %v2409_v26  ;;  %3174 = vmatprep.mubr.msk.f32.mxu0 %vm3341_vm0, %v3340_v1 }
 0x9c5   : > { %3177 = vmatprep.subr.mxu0 %v3340_v1 }
 0x9ca   : > { %v2404_v29 = vpop.f32.mrf.mxu1 }
 0x9cb   : > { %v2405_v30 = vadd.f32 %v2898_v22, %v2404_v29 }
 0x9cc   : > { %v3171_v31 = vpop.f32.mrf.mxu1 }
 0x9cd   : > { %3175 = vmatmul.mubr.msk.f32.vlgmr.msra.gmra.mxu0 %vm757_vm2, %v2405_v30 }
 0x9ce   : > { %3178 = vmatpush3.msra.mxu0 %v2495_v32  ;;  %3179 = vmatprep.mubr.msk.f32.mxu0 %vm3341_vm0, %v3340_v1 }
 0xa83   : > { %v2320_v34 = vpop.f32.mrf.mxu0 }
 0xa84   : > { %v2324_v35 = vadd.f32 %v2320_v34, %v2002_v33 }
 0xa85   : > { %v3160_v36 = vpop.f32.mrf.mxu0 }
 0xa8d   : > { %v2479_v37 = vpop.f32.mrf.mxu0 }
 0xa8e   : > { %v2483_v38 = vsel %vm757_vm2, %v2479_v37, -inf }
 0xa8f   : > { %2484 = vmax.xlane.f32.xlu1 %v2483_v38  ;;  %v3176_v39 = vpop.f32.mrf.mxu0 }
 0xb18   : > { %v2485_v40 = vpop.xlane.xlu1 %2484 }
 0xb19   : > { %v2486_v41 = vsub.f32 %v2479_v37, %v2485_v40 }
 0xb1b   : > { %v2487_v42 = vmul.f32 1.442695, %v2486_v41 }
 0xb1d   : > { %3256 = vpow2.f32 %v2487_v42 }
 0xb2a   : > { %v3257_v43 = vpop.eup %3256 }
 0xb2b   : > { %v2489_v44 = vsel %vm757_vm2, %v3257_v43, 0.0 }
 0xb2c   : > { %2490 = vadd.xlane.f32.xlu1 %v2489_v44 }
 0xbb5   : > { %v2491_v1 = vpop.xlane.xlu1 %2490 }
 0xbb6   : > { %3258 = vrcp.f32 %v2491_v1 }
 0xbc3   : > { %v3259_v45 = vpop.eup %3258 }
 0xbc4   : > { %v2493_v46 = vmul.f32 %v3259_v45, %v3257_v43 }
 0xbc6   : > { %3180 = vmatmul.mubr.msk.f32.vlgmr.msra.gmra.mxu0 %vm757_vm2, %v2493_v46 }
 0xc86   : > { %v2565_v49 = vpop.f32.mrf.mxu0 }
 0xc87   : > { %3185 = vmatmul.mubr.msk.f32.vlgmr.msra.gmra.mxu1 %vm757_vm2, %v2565_v49 }
 0xc88   : > { %v3181_v50 = vpop.f32.mrf.mxu0 }
 0xd47   : > { %v2640_v51 = vpop.f32.mrf.mxu1 }
 0xd48   : > { %v2644_v53 = vadd.f32 %v2640_v51, %v2324_v35 }
 0xd49   : > { %v3186_v54 = vpop.f32.mrf.mxu1 }
 0xd4a   : > { %v2652_v56 = vadd.f32 %v2904_v52, %v2644_v53 }
 0xd4c   : > { %v2654_v57 = vadd.f32 %v2653_v55, %v2652_v56 }
 0xd4e   : > { %v2655_v58 = vsel %vm567_vm1, %v2654_v57, 0.0 }
 0xd4f   : > { %2656 = vadd.xlane.f32.xlu0 %v2655_v58 }
 0xdd8   : > { %v2657_v59 = vpop.xlane.xlu0 %2656 }
 0xdd9   : > { %v2658_v60 = vmul.f32 0.03125, %v2657_v59 }
 0xddb   : > { %v2659_v61 = vsub.f32 %v2654_v57, %v2658_v60 }
 0xddd   : > { %v2660_v62 = vmul.f32 %v2659_v61, %v2659_v61 }
 0xddf   : > { %v2661_v63 = vsel %vm567_vm1, %v2660_v62, 0.0 }
 0xde0   : > { %2662 = vadd.xlane.f32.xlu1 %v2661_v63 }
 0xe69   : > { %v2663_v0 = vpop.xlane.xlu1 %2662 }
 0xe6a   : > { %v2664_v2 = vmul.f32 0.03125, %v2663_v0 }
 0xe6c   : > { %v2665_v3 = vadd.f32 1e-05, %v2664_v2 }
 0xe6e   : > { %3260 = vrsqrt.f32 %v2665_v3 }
 0xe7b   : > { %v3261_v4 = vpop.eup %3260 }
 0xe7c   : > { %v2667_v6 = vmul.f32 %v3261_v4, %v2659_v61 }
 0xe7e   : > { %v2675_v8 = vmul.f32 %v2905_v5, %v2667_v6 }
 0xe80   : > { %v2683_v9 = vadd.f32 %v2906_v7, %v2675_v8 }
 0xe82   : > { %2684 = vst.msk [vmem:[%s527_s26] sm:$0xff] %vm567_vm1, %v2683_v9 }
 0xe83   : > { %3275 = shalt.err (!%p3272_p5)
}
 0xe84   : > { %s3276_s1 = scalar_lea.hbm %s2698_s2, 128  ;;  %s3280_s17 = scalar_lea.hbm %s3919_s14, 256 }
 0xe85   : > { %p3277_p6 = scmp.ne.s32.totalorder %s2698_s2, %s3276_s1  ;;  %p3281_p10 = scmp.lt.s32.totalorder %s2698_s2, %s3919_s14 }
 0xe86   : > { %p3282_p11 = scmp.lt.s32.totalorder %s3280_s17, %s3276_s1 }
 0xe87   : > { %p3278_p7 = pnand %p3277_p6, %p3458_p4 }
 0xe88   : > { %p3283_p12 = por %p3282_p11, %p3281_p10 }
 0xe89   : > { %p3279_p9 = pneg %p3278_p7 }
 0xe8b   : > { %p3284_p13 = pnand %p3283_p12, %p3279_p9 }
 0xe8d   : > { %3287 = shalt.err (!%p3284_p13)
}
 0xe8e   : > { %3187 = dma.vmem_to_hbm [thread:$0]  (%p3458_p4), %s2701_s20, 128, %s2698_s2, %s2686_s3  }
 0xe8f PF: > { %p3193_p0 = scmp.ge.s32.totalorder %s3338_s18, 2  ;;  %s2712_s24 = sand.u32 1, %s3318_s29  }
 0xe90   : > { %s2713_s27 = scalar_lea.sflag [#allocation5], %s2712_s24 }
 0xe91   : > { %p3190_p1 = pnand %p3193_p0, %p3465_p8 }
 0xe93   : > { %p3191_p2 = pneg %p3190_p1 }
 0xe95   : > { %3313 = dma.done.wait (%p3191_p2), %s2713_s27, 128  }
 0xe96   : > { %3315 = vsyncadd (%p3191_p2), %s2713_s27, 4294967168  ;;  %s27_s18 = sadd.s32 1, %s3338_s18   ;;  %s3935_s22 = sld [smem:[#allocation9_spill]] }
 0xe97   : > { %p24_p3 = scmp.ge.s32.totalorder %s27_s18, 4   ;;  %s3936_s16 = sld [smem:[#allocation7_spill]] }
 0xe98   : > { %s3937_s17 = sld [smem:[#allocation8_spill]]  ;;  %s3938_s29 = smov %s3322_s30 }
 0xe99   : > { %s3939_s30 = smov %s3326_s15  ;;  %26 = sbr.rel (!%p24_p3) target bundleno = 9 (0x9), region = 157 }
 0xe9c   : > { %s3940_s15 = smov %s3935_s22 }
 0xe9e   :  { %2718 = vsyncpa [#allocation5], 1 }
 0xe9f   :  { %2720 = vsyncpa [#allocation5 + $0x1], 1 }

</bundles_post_ra>
